<compile_context>
chip_gen: v6e
topology: v6e:2x2x1
jax: 0.10.0
libtpu: 0.0.40
codegen_flags: <defaults>
</compile_context>

<pallas_src>
import jax
import jax.numpy as jnp
from jax.experimental import pallas as pl
from jax.experimental.pallas import tpu as pltpu

DIM_IN = 128                 # dim_in (module default)
EXPANSION = 2
KERNEL_SIZE = 31
INNER = DIM_IN * EXPANSION   # 256
INNER2 = INNER * 2           # 512
EPS = 1e-5                   # nn.LayerNorm default
HIST = 32                    # sublane-aligned history rows (>= KERNEL_SIZE - 1)
N_ACC = 4                    # independent partial accumulators in the tap loop


def convblock_kernel(x_ref, w1_ref, b1_ref, wdw_ref, bdw_ref, w2_ref, b2_ref,
                     o_ref, hext_ref, carry_ref):
    # grid = (batch, time-tile); time is the inner, sequential ("arbitrary") axis.
    jt = pl.program_id(1)

    # Reset the depthwise history at the start of every sequence (causal zero padding).
    @pl.when(jt == 0)
    def _():
        carry_ref[...] = jnp.zeros_like(carry_ref)

    x = x_ref[0]                                   # (TT, C) f32
    TT = x.shape[0]
    tap_dtype = hext_ref.dtype                     # f32 (v5e) or bf16 (v6e/v7x)

    # --- LayerNorm over the channel dim (f32); affine is folded into W1/b1 ---
    mean = jnp.mean(x, axis=-1, keepdims=True)
    var = jnp.mean((x - mean) ** 2, axis=-1, keepdims=True)
    xn = (x - mean) * jax.lax.rsqrt(var + EPS)

    # --- pointwise Conv1d(dim_in -> 2*inner): bf16 MXU operands, f32 accumulation ---
    y = jnp.dot(xn.astype(jnp.bfloat16), w1_ref[...],
                preferred_element_type=jnp.float32) + b1_ref[...]

    # --- GLU along channels (f32) ---
    h = y[:, :INNER] * jax.nn.sigmoid(y[:, INNER:])          # (TT, INNER)

    # --- causal depthwise conv (kernel K, groups=INNER), tiled with a history carry ---
    # hext rows [0, HIST)        = last HIST rows of h before this tile (zeros for jt==0)
    # hext rows [HIST, HIST+TT)  = h of the current tile          (both writes aligned)
    hext_ref[0:HIST, :] = carry_ref[...]
    hext_ref[HIST:HIST + TT, :] = h.astype(tap_dtype)
    # Next tile's history = last HIST rows of the extended buffer (correct for any TT).
    carry_ref[...] = hext_ref[pl.ds(TT, HIST), :]

    w_dw = wdw_ref[...]                                      # hoisted: (HIST, INNER)
    base = HIST - (KERNEL_SIZE - 1)                          # = 2
    partial = [None] * N_ACC
    for k in range(KERNEL_SIZE):                             # static unroll, 31 taps
        term = hext_ref[pl.ds(base + k, TT), :] * w_dw[k:k + 1, :]   # tap_dtype VPU math
        i = k % N_ACC
        partial[i] = term if partial[i] is None else partial[i] + term
    # Combine the 4 partials + bias in f32 (keeps accumulation error bounded when
    # tap_dtype is bf16; no-op cast when tap_dtype is f32).
    acc = ((partial[0].astype(jnp.float32) + partial[1].astype(jnp.float32)) +
           (partial[2].astype(jnp.float32) + partial[3].astype(jnp.float32)) +
           bdw_ref[...])

    # --- Swish (f32) ---
    z = acc * jax.nn.sigmoid(acc)

    # --- pointwise Conv1d(inner -> dim_in): bf16 MXU operands, f32 accumulation ---
    out2 = jnp.dot(z.astype(jnp.bfloat16), w2_ref[...],
                   preferred_element_type=jnp.float32) + b2_ref[...]

    # --- residual ---
    o_ref[0] = (x + out2).astype(o_ref.dtype)


def _pick_time_tile(T, tt_max=1024):
    """Largest multiple of 8 that divides T and is <= tt_max (else the full T)."""
    if T <= tt_max:
        return T
    for tt in range(tt_max - tt_max % 8, 7, -8):
        if T % tt == 0:
            return tt
    return T


def _default_use_bf16_taps():
    """bf16 tap math only on chips with a bf16 VPU (v6e / v7x); f32 elsewhere (v5e)."""
    try:
        kind = jax.devices()[0].device_kind.lower()
    except Exception:
        return False
    return any(tag in kind for tag in ("v6", "v7", "7x", "trillium"))


def conv_block_forward_btc(x_btc, params, *, time_tile=None, use_bf16_taps=None):
    """ConvBlock forward, channels-last (B, T, C) in / out (no transposes)."""
    g1, bt1, w1, b1, wdw, bdw, w2, b2 = params
    B, T, C = x_btc.shape
    assert C == DIM_IN
    assert T % 8 == 0, "time length must be a multiple of 8"
    tt = _pick_time_tile(T) if time_tile is None else time_tile
    assert T % tt == 0 and (tt % 8 == 0 or tt == T)
    n_t = T // tt
    if use_bf16_taps is None:
        use_bf16_taps = _default_use_bf16_taps()
    tap_dtype = jnp.bfloat16 if use_bf16_taps else jnp.float32

    # Fold the LayerNorm affine into the first matmul (wrapper-side precompute):
    #   y = (xn*g + b) @ W1 + b1  ==  xn @ (diag(g) @ W1) + (b @ W1 + b1)
    w1_eff = w1 * jnp.reshape(g1, (DIM_IN, 1))
    b1_eff = jnp.dot(bt1, w1) + b1                           # (1, INNER2), f32

    # Pre-cast matmul weights to bf16 once (MXU-native on v5e/v6e/v7x); pad the
    # depthwise taps to a sublane-aligned 32-row matrix (row 31 is zero, unused) and
    # cast them to the tap dtype.
    w1_bf = w1_eff.astype(jnp.bfloat16)
    w2_bf = w2.astype(jnp.bfloat16)
    wdw_p = jnp.concatenate(
        [wdw, jnp.zeros((HIST - KERNEL_SIZE, INNER), wdw.dtype)], axis=0
    ).astype(tap_dtype)

    grid_spec = pltpu.PrefetchScalarGridSpec(
        num_scalar_prefetch=0,
        grid=(B, n_t),
        in_specs=[
            pl.BlockSpec((1, tt, C), lambda b, t: (b, t, 0)),        # x tile
            pl.BlockSpec((C, INNER2), lambda b, t: (0, 0)),          # W1' (bf16, LN-folded)
            pl.BlockSpec((1, INNER2), lambda b, t: (0, 0)),          # b1' (f32)
            pl.BlockSpec((HIST, INNER), lambda b, t: (0, 0)),        # depthwise W (padded)
            pl.BlockSpec((1, INNER), lambda b, t: (0, 0)),           # depthwise b (f32)
            pl.BlockSpec((INNER, C), lambda b, t: (0, 0)),           # W2 (bf16)
            pl.BlockSpec((1, C), lambda b, t: (0, 0)),               # b2 (f32)
        ],
        out_specs=pl.BlockSpec((1, tt, C), lambda b, t: (b, t, 0)),
        scratch_shapes=[
            pltpu.VMEM((HIST + tt, INNER), tap_dtype),               # aligned halo + h
            pltpu.VMEM((HIST, INNER), tap_dtype),                    # carried history
        ],
    )

    return pl.pallas_call(
        convblock_kernel,
        out_shape=jax.ShapeDtypeStruct((B, T, C), x_btc.dtype),
        grid_spec=grid_spec,
        compiler_params=pltpu.CompilerParams(
            dimension_semantics=("parallel", "arbitrary"),
            vmem_limit_bytes=32 * 1024 * 1024),
    )(x_btc, w1_bf, b1_eff, wdw_p, bdw, w2_bf, b2)


def conv_block_forward(x_nct, params, *, time_tile=None, use_bf16_taps=None):
    """PyTorch-layout entry point: (B, dim_in, T) in / out.

    Prefer conv_block_forward_btc when the surrounding model is channels-last:
    it skips the two extra HBM transpose passes entirely.
    """
    x = jnp.transpose(x_nct, (0, 2, 1))                      # (B, T, C)
    out = conv_block_forward_btc(x, params, time_tile=time_tile,
                                 use_bf16_taps=use_bf16_taps)
    return jnp.transpose(out, (0, 2, 1))                     # back to (B, C, T)


def reference_forward(x_nct, params, matmul_dtype=jnp.float32):
    """Pure-JAX reference replicating the PyTorch forward (NCT in / out).

    matmul_dtype=bfloat16 mirrors the kernel's bf16-operand / f32-accumulate MXU
    matmuls; float32 is the exact PyTorch-default-precision forward.
    """
    g1, bt1, w1, b1, wdw, bdw, w2, b2 = params
    cast = lambda a: a.astype(matmul_dtype)
    x = jnp.transpose(x_nct, (0, 2, 1))                      # (B, T, C)
    mean = x.mean(-1, keepdims=True)
    var = ((x - mean) ** 2).mean(-1, keepdims=True)
    xn = (x - mean) * jax.lax.rsqrt(var + EPS) * g1 + bt1
    y = jnp.dot(cast(xn), cast(w1), preferred_element_type=jnp.float32) + b1
    h = y[..., :INNER] * jax.nn.sigmoid(y[..., INNER:])
    Tt = h.shape[1]
    h_pad = jnp.pad(h, ((0, 0), (KERNEL_SIZE - 1, 0), (0, 0)))
    acc = jnp.zeros_like(h) + bdw
    for k in range(KERNEL_SIZE):
        acc = acc + h_pad[:, k:k + Tt, :] * wdw[k:k + 1, :]
    z = acc * jax.nn.sigmoid(acc)
    out = jnp.dot(cast(z), cast(w2), preferred_element_type=jnp.float32) + b2
    return jnp.transpose(x + out, (0, 2, 1))


def make_params(key):
    """Deterministic synthetic parameters with PyTorch-consistent shapes."""
    ks = jax.random.split(key, 8)
    # LayerNorm(dim_in): weight/bias (dim_in,)
    g1 = 1.0 + 0.1 * jax.random.normal(ks[0], (1, DIM_IN), jnp.float32)
    bt1 = 0.1 * jax.random.normal(ks[1], (1, DIM_IN), jnp.float32)
    # Conv1d(dim_in, 2*inner, 1): weight (2*inner, dim_in, 1), bias (2*inner,)
    w1_pt = 0.05 * jax.random.normal(ks[2], (INNER2, DIM_IN, 1), jnp.float32)
    b1_pt = 0.05 * jax.random.normal(ks[3], (INNER2,), jnp.float32)
    # DepthWiseConv1D: Conv1d(inner, inner, K, groups=inner): weight (inner, 1, K), bias (inner,)
    wdw_pt = 0.05 * jax.random.normal(ks[4], (INNER, 1, KERNEL_SIZE), jnp.float32)
    bdw_pt = 0.05 * jax.random.normal(ks[5], (INNER,), jnp.float32)
    # Conv1d(inner, dim_in, 1): weight (dim_in, inner, 1), bias (dim_in,)
    w2_pt = 0.05 * jax.random.normal(ks[6], (DIM_IN, INNER, 1), jnp.float32)
    b2_pt = 0.05 * jax.random.normal(ks[7], (DIM_IN,), jnp.float32)

    # Re-layout for the channels-last kernel.
    w1 = jnp.transpose(w1_pt[:, :, 0], (1, 0))              # (dim_in, 2*inner)
    b1 = b1_pt[None, :]                                     # (1, 2*inner)
    wdw = jnp.transpose(wdw_pt[:, 0, :], (1, 0))            # (K, inner)
    bdw = bdw_pt[None, :]                                   # (1, inner)
    w2 = jnp.transpose(w2_pt[:, :, 0], (1, 0))              # (inner, dim_in)
    b2 = b2_pt[None, :]                                     # (1, dim_in)
    return (g1, bt1, w1, b1, wdw, bdw, w2, b2)


if __name__ == "__main__":
    key = jax.random.PRNGKey(0)
    kx1, kx2, kp = jax.random.split(key, 3)
    params = make_params(kp)

    # Case 1: tiny sequence -> single time tile.
    B, T = 2, 16
    x1 = jax.random.normal(kx1, (B, DIM_IN, T), jnp.float32)     # PyTorch NCT input
    out1 = jax.block_until_ready(conv_block_forward(x1, params))
    ref1_bf = jax.block_until_ready(reference_forward(x1, params, jnp.bfloat16))
    ref1_f32 = jax.block_until_ready(reference_forward(x1, params, jnp.float32))
    assert out1.shape == x1.shape
    assert jnp.allclose(out1, ref1_bf, rtol=1e-2, atol=1e-2), \
        float(jnp.max(jnp.abs(out1 - ref1_bf)))
    assert jnp.allclose(out1, ref1_f32, rtol=2e-2, atol=2e-2), \
        float(jnp.max(jnp.abs(out1 - ref1_f32)))

    # Case 2: longer sequence with a forced small time tile -> exercises the
    # 30-row causal halo being carried across several sequential time tiles.
    B, T = 2, 128
    x2 = jax.random.normal(kx2, (B, DIM_IN, T), jnp.float32)
    out2 = jax.block_until_ready(conv_block_forward(x2, params, time_tile=16))
    ref2_bf = jax.block_until_ready(reference_forward(x2, params, jnp.bfloat16))
    ref2_f32 = jax.block_until_ready(reference_forward(x2, params, jnp.float32))
    assert out2.shape == x2.shape
    assert jnp.allclose(out2, ref2_bf, rtol=1e-2, atol=1e-2), \
        float(jnp.max(jnp.abs(out2 - ref2_bf)))
    assert jnp.allclose(out2, ref2_f32, rtol=2e-2, atol=2e-2), \
        float(jnp.max(jnp.abs(out2 - ref2_f32)))

    print("KERNEL_OK")
</pallas_src>

<mosaic_0001>
module attributes {stable_mosaic.version = 11 : i64} {
  func.func @convblock_kernel(%arg0: i32, %arg1: i32, %arg2: memref<1x16x128xf32, #tpu.memory_space<vmem>>, %arg3: memref<128x512xbf16, #tpu.memory_space<vmem>>, %arg4: memref<1x512xf32, #tpu.memory_space<vmem>>, %arg5: memref<32x256xf32, #tpu.memory_space<vmem>>, %arg6: memref<1x256xf32, #tpu.memory_space<vmem>>, %arg7: memref<256x128xbf16, #tpu.memory_space<vmem>>, %arg8: memref<1x128xf32, #tpu.memory_space<vmem>>, %arg9: memref<1x16x128xf32, #tpu.memory_space<vmem>>, %arg10: memref<48x256xf32, #tpu.memory_space<vmem>>, %arg11: memref<32x256xf32, #tpu.memory_space<vmem>>) attributes {dimension_semantics = [#tpu.dimension_semantics<parallel>, #tpu.dimension_semantics<arbitrary>], iteration_bounds = array<i64: 2, 1>, scalar_prefetch = 0 : i64, scratch_operands = 2 : i64, tpu.core_type = #tpu.core_type<tc>, window_params = [{transform_indices = @transform_0, window_bounds = array<i64: 1, 16, 128>}, {pipeline_mode = #tpu.pipeline_mode<synchronous>, transform_indices = @transform_1, window_bounds = array<i64: 128, 512>}, {pipeline_mode = #tpu.pipeline_mode<synchronous>, transform_indices = @transform_2, window_bounds = array<i64: 1, 512>}, {pipeline_mode = #tpu.pipeline_mode<synchronous>, transform_indices = @transform_3, window_bounds = array<i64: 32, 256>}, {pipeline_mode = #tpu.pipeline_mode<synchronous>, transform_indices = @transform_4, window_bounds = array<i64: 1, 256>}, {pipeline_mode = #tpu.pipeline_mode<synchronous>, transform_indices = @transform_5, window_bounds = array<i64: 256, 128>}, {pipeline_mode = #tpu.pipeline_mode<synchronous>, transform_indices = @transform_6, window_bounds = array<i64: 1, 128>}, {transform_indices = @transform_7, window_bounds = array<i64: 1, 16, 128>}]} {
    %c0_i32 = arith.constant 0 : i32
    %0 = arith.cmpi eq, %arg1, %c0_i32 : i32
    %1 = arith.extui %0 : i1 to i32
    %c0_i32_0 = arith.constant 0 : i32
    %2 = arith.cmpi ne, %1, %c0_i32_0 : i32
    scf.if %2 {
      %cst_67 = arith.constant 0.000000e+00 : f32
      %216 = vector.broadcast %cst_67 : f32 to vector<32x256xf32>
      %c0_68 = arith.constant 0 : index
      %c0_69 = arith.constant 0 : index
      %217 = vector.load %arg11[%c0_68, %c0_69] : memref<32x256xf32, #tpu.memory_space<vmem>>, vector<32x256xf32>
      tpu.vector_store %arg11[%c0_68, %c0_69], %216 {strides = array<i32>} : memref<32x256xf32, #tpu.memory_space<vmem>>, vector<32x256xf32>,
    } else {
    }
    %c0 = arith.constant 0 : index
    %c0_1 = arith.constant 0 : index
    %c0_2 = arith.constant 0 : index
    %3 = vector.load %arg2[%c0, %c0_1, %c0_2] : memref<1x16x128xf32, #tpu.memory_space<vmem>>, vector<1x16x128xf32>
    %4 = vector.shape_cast %3 : vector<1x16x128xf32> to vector<16x128xf32>
    %cst = arith.constant dense<0.000000e+00> : vector<16xf32>
    %5 = vector.multi_reduction <add>, %4, %cst [1] : vector<16x128xf32> to vector<16xf32>
    %6 = vector.shape_cast %5 : vector<16xf32> to vector<16x1xf32>
    %cst_3 = arith.constant 1.280000e+02 : f32
    %7 = vector.broadcast %cst_3 : f32 to vector<16x1xf32>
    %8 = arith.divf %6, %7 : vector<16x1xf32>
    %9 = vector.broadcast %8 : vector<16x1xf32> to vector<16x128xf32>
    %10 = arith.subf %4, %9 : vector<16x128xf32>
    %11 = arith.mulf %10, %10 : vector<16x128xf32>
    %cst_4 = arith.constant dense<0.000000e+00> : vector<16xf32>
    %12 = vector.multi_reduction <add>, %11, %cst_4 [1] : vector<16x128xf32> to vector<16xf32>
    %13 = vector.shape_cast %12 : vector<16xf32> to vector<16x1xf32>
    %cst_5 = arith.constant 1.280000e+02 : f32
    %14 = vector.broadcast %cst_5 : f32 to vector<16x1xf32>
    %15 = arith.divf %13, %14 : vector<16x1xf32>
    %16 = vector.broadcast %8 : vector<16x1xf32> to vector<16x128xf32>
    %17 = arith.subf %4, %16 : vector<16x128xf32>
    %cst_6 = arith.constant 9.99999974E-6 : f32
    %18 = vector.broadcast %cst_6 : f32 to vector<16x1xf32>
    %19 = arith.addf %15, %18 : vector<16x1xf32>
    %20 = math.rsqrt %19 : vector<16x1xf32>
    %21 = vector.broadcast %20 : vector<16x1xf32> to vector<16x128xf32>
    %22 = arith.mulf %17, %21 : vector<16x128xf32>
    %23 = arith.truncf %22 : vector<16x128xf32> to vector<16x128xbf16>
    %c0_7 = arith.constant 0 : index
    %c0_8 = arith.constant 0 : index
    %24 = vector.load %arg3[%c0_7, %c0_8] : memref<128x512xbf16, #tpu.memory_space<vmem>>, vector<128x512xbf16>
    %cst_9 = arith.constant dense<0.000000e+00> : vector<16x512xf32>
    %25 = tpu.matmul %23, %24, %cst_9 {dimension_numbers = #tpu.dot_dimension_numbers<[1], [0], [0], [1], [0, 0, 1, 1], [], []>} : vector<16x128xbf16>, vector<128x512xbf16>, vector<16x512xf32> -> vector<16x512xf32>
    %c0_10 = arith.constant 0 : index
    %c0_11 = arith.constant 0 : index
    %26 = vector.load %arg4[%c0_10, %c0_11] : memref<1x512xf32, #tpu.memory_space<vmem>>, vector<1x512xf32>
    %27 = vector.broadcast %26 : vector<1x512xf32> to vector<16x512xf32>
    %28 = arith.addf %25, %27 : vector<16x512xf32>
    %29 = vector.extract_strided_slice %28 {offsets = [0, 0], sizes = [16, 256], strides = [1, 1]} : vector<16x512xf32> to vector<16x256xf32>
    %30 = vector.extract_strided_slice %28 {offsets = [0, 256], sizes = [16, 256], strides = [1, 1]} : vector<16x512xf32> to vector<16x256xf32>
    %31 = arith.negf %30 : vector<16x256xf32>
    %32 = math.exp %31 : vector<16x256xf32>
    %cst_12 = arith.constant 1.000000e+00 : f32
    %33 = vector.broadcast %cst_12 : f32 to vector<16x256xf32>
    %34 = arith.addf %33, %32 : vector<16x256xf32>
    %35 = arith.divf %33, %34 : vector<16x256xf32>
    %36 = arith.mulf %29, %35 : vector<16x256xf32>
    %c0_13 = arith.constant 0 : index
    %c0_14 = arith.constant 0 : index
    %37 = vector.load %arg11[%c0_13, %c0_14] : memref<32x256xf32, #tpu.memory_space<vmem>>, vector<32x256xf32>
    %c0_15 = arith.constant 0 : index
    %c0_16 = arith.constant 0 : index
    %38 = vector.load %arg10[%c0_15, %c0_16] : memref<48x256xf32, #tpu.memory_space<vmem>>, vector<32x256xf32>
    tpu.vector_store %arg10[%c0_15, %c0_16], %37 {strides = array<i32>} : memref<48x256xf32, #tpu.memory_space<vmem>>, vector<32x256xf32>,
    %c32 = arith.constant 32 : index
    %c0_17 = arith.constant 0 : index
    %39 = vector.load %arg10[%c32, %c0_17] : memref<48x256xf32, #tpu.memory_space<vmem>>, vector<16x256xf32>
    tpu.vector_store %arg10[%c32, %c0_17], %36 {strides = array<i32>} : memref<48x256xf32, #tpu.memory_space<vmem>>, vector<16x256xf32>,
    %c16 = arith.constant 16 : index
    %c0_18 = arith.constant 0 : index
    %40 = vector.load %arg10[%c16, %c0_18] : memref<48x256xf32, #tpu.memory_space<vmem>>, vector<32x256xf32>
    %c0_19 = arith.constant 0 : index
    %c0_20 = arith.constant 0 : index
    %41 = vector.load %arg11[%c0_19, %c0_20] : memref<32x256xf32, #tpu.memory_space<vmem>>, vector<32x256xf32>
    tpu.vector_store %arg11[%c0_19, %c0_20], %40 {strides = array<i32>} : memref<32x256xf32, #tpu.memory_space<vmem>>, vector<32x256xf32>,
    %c0_21 = arith.constant 0 : index
    %c0_22 = arith.constant 0 : index
    %42 = vector.load %arg5[%c0_21, %c0_22] : memref<32x256xf32, #tpu.memory_space<vmem>>, vector<32x256xf32>
    %c2 = arith.constant 2 : index
    %c0_23 = arith.constant 0 : index
    %43 = vector.load %arg10[%c2, %c0_23] : memref<48x256xf32, #tpu.memory_space<vmem>>, vector<16x256xf32>
    %44 = vector.extract_strided_slice %42 {offsets = [0, 0], sizes = [1, 256], strides = [1, 1]} : vector<32x256xf32> to vector<1x256xf32>
    %45 = vector.broadcast %44 : vector<1x256xf32> to vector<16x256xf32>
    %46 = arith.mulf %43, %45 : vector<16x256xf32>
    %c3 = arith.constant 3 : index
    %c0_24 = arith.constant 0 : index
    %47 = vector.load %arg10[%c3, %c0_24] : memref<48x256xf32, #tpu.memory_space<vmem>>, vector<16x256xf32>
    %48 = vector.extract_strided_slice %42 {offsets = [1, 0], sizes = [1, 256], strides = [1, 1]} : vector<32x256xf32> to vector<1x256xf32>
    %49 = vector.broadcast %48 : vector<1x256xf32> to vector<16x256xf32>
    %50 = arith.mulf %47, %49 : vector<16x256xf32>
    %c4 = arith.constant 4 : index
    %c0_25 = arith.constant 0 : index
    %51 = vector.load %arg10[%c4, %c0_25] : memref<48x256xf32, #tpu.memory_space<vmem>>, vector<16x256xf32>
    %52 = vector.extract_strided_slice %42 {offsets = [2, 0], sizes = [1, 256], strides = [1, 1]} : vector<32x256xf32> to vector<1x256xf32>
    %53 = vector.broadcast %52 : vector<1x256xf32> to vector<16x256xf32>
    %54 = arith.mulf %51, %53 : vector<16x256xf32>
    %c5 = arith.constant 5 : index
    %c0_26 = arith.constant 0 : index
    %55 = vector.load %arg10[%c5, %c0_26] : memref<48x256xf32, #tpu.memory_space<vmem>>, vector<16x256xf32>
    %56 = vector.extract_strided_slice %42 {offsets = [3, 0], sizes = [1, 256], strides = [1, 1]} : vector<32x256xf32> to vector<1x256xf32>
    %57 = vector.broadcast %56 : vector<1x256xf32> to vector<16x256xf32>
    %58 = arith.mulf %55, %57 : vector<16x256xf32>
    %c6 = arith.constant 6 : index
    %c0_27 = arith.constant 0 : index
    %59 = vector.load %arg10[%c6, %c0_27] : memref<48x256xf32, #tpu.memory_space<vmem>>, vector<16x256xf32>
    %60 = vector.extract_strided_slice %42 {offsets = [4, 0], sizes = [1, 256], strides = [1, 1]} : vector<32x256xf32> to vector<1x256xf32>
    %61 = vector.broadcast %60 : vector<1x256xf32> to vector<16x256xf32>
    %62 = arith.mulf %59, %61 : vector<16x256xf32>
    %63 = arith.addf %46, %62 : vector<16x256xf32>
    %c7 = arith.constant 7 : index
    %c0_28 = arith.constant 0 : index
    %64 = vector.load %arg10[%c7, %c0_28] : memref<48x256xf32, #tpu.memory_space<vmem>>, vector<16x256xf32>
    %65 = vector.extract_strided_slice %42 {offsets = [5, 0], sizes = [1, 256], strides = [1, 1]} : vector<32x256xf32> to vector<1x256xf32>
    %66 = vector.broadcast %65 : vector<1x256xf32> to vector<16x256xf32>
    %67 = arith.mulf %64, %66 : vector<16x256xf32>
    %68 = arith.addf %50, %67 : vector<16x256xf32>
    %c8 = arith.constant 8 : index
    %c0_29 = arith.constant 0 : index
    %69 = vector.load %arg10[%c8, %c0_29] : memref<48x256xf32, #tpu.memory_space<vmem>>, vector<16x256xf32>
    %70 = vector.extract_strided_slice %42 {offsets = [6, 0], sizes = [1, 256], strides = [1, 1]} : vector<32x256xf32> to vector<1x256xf32>
    %71 = vector.broadcast %70 : vector<1x256xf32> to vector<16x256xf32>
    %72 = arith.mulf %69, %71 : vector<16x256xf32>
    %73 = arith.addf %54, %72 : vector<16x256xf32>
    %c9 = arith.constant 9 : index
    %c0_30 = arith.constant 0 : index
    %74 = vector.load %arg10[%c9, %c0_30] : memref<48x256xf32, #tpu.memory_space<vmem>>, vector<16x256xf32>
    %75 = vector.extract_strided_slice %42 {offsets = [7, 0], sizes = [1, 256], strides = [1, 1]} : vector<32x256xf32> to vector<1x256xf32>
    %76 = vector.broadcast %75 : vector<1x256xf32> to vector<16x256xf32>
    %77 = arith.mulf %74, %76 : vector<16x256xf32>
    %78 = arith.addf %58, %77 : vector<16x256xf32>
    %c10 = arith.constant 10 : index
    %c0_31 = arith.constant 0 : index
    %79 = vector.load %arg10[%c10, %c0_31] : memref<48x256xf32, #tpu.memory_space<vmem>>, vector<16x256xf32>
    %80 = vector.extract_strided_slice %42 {offsets = [8, 0], sizes = [1, 256], strides = [1, 1]} : vector<32x256xf32> to vector<1x256xf32>
    %81 = vector.broadcast %80 : vector<1x256xf32> to vector<16x256xf32>
    %82 = arith.mulf %79, %81 : vector<16x256xf32>
    %83 = arith.addf %63, %82 : vector<16x256xf32>
    %c11 = arith.constant 11 : index
    %c0_32 = arith.constant 0 : index
    %84 = vector.load %arg10[%c11, %c0_32] : memref<48x256xf32, #tpu.memory_space<vmem>>, vector<16x256xf32>
    %85 = vector.extract_strided_slice %42 {offsets = [9, 0], sizes = [1, 256], strides = [1, 1]} : vector<32x256xf32> to vector<1x256xf32>
    %86 = vector.broadcast %85 : vector<1x256xf32> to vector<16x256xf32>
    %87 = arith.mulf %84, %86 : vector<16x256xf32>
    %88 = arith.addf %68, %87 : vector<16x256xf32>
    %c12 = arith.constant 12 : index
    %c0_33 = arith.constant 0 : index
    %89 = vector.load %arg10[%c12, %c0_33] : memref<48x256xf32, #tpu.memory_space<vmem>>, vector<16x256xf32>
    %90 = vector.extract_strided_slice %42 {offsets = [10, 0], sizes = [1, 256], strides = [1, 1]} : vector<32x256xf32> to vector<1x256xf32>
    %91 = vector.broadcast %90 : vector<1x256xf32> to vector<16x256xf32>
    %92 = arith.mulf %89, %91 : vector<16x256xf32>
    %93 = arith.addf %73, %92 : vector<16x256xf32>
    %c13 = arith.constant 13 : index
    %c0_34 = arith.constant 0 : index
    %94 = vector.load %arg10[%c13, %c0_34] : memref<48x256xf32, #tpu.memory_space<vmem>>, vector<16x256xf32>
    %95 = vector.extract_strided_slice %42 {offsets = [11, 0], sizes = [1, 256], strides = [1, 1]} : vector<32x256xf32> to vector<1x256xf32>
    %96 = vector.broadcast %95 : vector<1x256xf32> to vector<16x256xf32>
    %97 = arith.mulf %94, %96 : vector<16x256xf32>
    %98 = arith.addf %78, %97 : vector<16x256xf32>
    %c14 = arith.constant 14 : index
    %c0_35 = arith.constant 0 : index
    %99 = vector.load %arg10[%c14, %c0_35] : memref<48x256xf32, #tpu.memory_space<vmem>>, vector<16x256xf32>
    %100 = vector.extract_strided_slice %42 {offsets = [12, 0], sizes = [1, 256], strides = [1, 1]} : vector<32x256xf32> to vector<1x256xf32>
    %101 = vector.broadcast %100 : vector<1x256xf32> to vector<16x256xf32>
    %102 = arith.mulf %99, %101 : vector<16x256xf32>
    %103 = arith.addf %83, %102 : vector<16x256xf32>
    %c15 = arith.constant 15 : index
    %c0_36 = arith.constant 0 : index
    %104 = vector.load %arg10[%c15, %c0_36] : memref<48x256xf32, #tpu.memory_space<vmem>>, vector<16x256xf32>
    %105 = vector.extract_strided_slice %42 {offsets = [13, 0], sizes = [1, 256], strides = [1, 1]} : vector<32x256xf32> to vector<1x256xf32>
    %106 = vector.broadcast %105 : vector<1x256xf32> to vector<16x256xf32>
    %107 = arith.mulf %104, %106 : vector<16x256xf32>
    %108 = arith.addf %88, %107 : vector<16x256xf32>
    %c16_37 = arith.constant 16 : index
    %c0_38 = arith.constant 0 : index
    %109 = vector.load %arg10[%c16_37, %c0_38] : memref<48x256xf32, #tpu.memory_space<vmem>>, vector<16x256xf32>
    %110 = vector.extract_strided_slice %42 {offsets = [14, 0], sizes = [1, 256], strides = [1, 1]} : vector<32x256xf32> to vector<1x256xf32>
    %111 = vector.broadcast %110 : vector<1x256xf32> to vector<16x256xf32>
    %112 = arith.mulf %109, %111 : vector<16x256xf32>
    %113 = arith.addf %93, %112 : vector<16x256xf32>
    %c17 = arith.constant 17 : index
    %c0_39 = arith.constant 0 : index
    %114 = vector.load %arg10[%c17, %c0_39] : memref<48x256xf32, #tpu.memory_space<vmem>>, vector<16x256xf32>
    %115 = vector.extract_strided_slice %42 {offsets = [15, 0], sizes = [1, 256], strides = [1, 1]} : vector<32x256xf32> to vector<1x256xf32>
    %116 = vector.broadcast %115 : vector<1x256xf32> to vector<16x256xf32>
    %117 = arith.mulf %114, %116 : vector<16x256xf32>
    %118 = arith.addf %98, %117 : vector<16x256xf32>
    %c18 = arith.constant 18 : index
    %c0_40 = arith.constant 0 : index
    %119 = vector.load %arg10[%c18, %c0_40] : memref<48x256xf32, #tpu.memory_space<vmem>>, vector<16x256xf32>
    %120 = vector.extract_strided_slice %42 {offsets = [16, 0], sizes = [1, 256], strides = [1, 1]} : vector<32x256xf32> to vector<1x256xf32>
    %121 = vector.broadcast %120 : vector<1x256xf32> to vector<16x256xf32>
    %122 = arith.mulf %119, %121 : vector<16x256xf32>
    %123 = arith.addf %103, %122 : vector<16x256xf32>
    %c19 = arith.constant 19 : index
    %c0_41 = arith.constant 0 : index
    %124 = vector.load %arg10[%c19, %c0_41] : memref<48x256xf32, #tpu.memory_space<vmem>>, vector<16x256xf32>
    %125 = vector.extract_strided_slice %42 {offsets = [17, 0], sizes = [1, 256], strides = [1, 1]} : vector<32x256xf32> to vector<1x256xf32>
    %126 = vector.broadcast %125 : vector<1x256xf32> to vector<16x256xf32>
    %127 = arith.mulf %124, %126 : vector<16x256xf32>
    %128 = arith.addf %108, %127 : vector<16x256xf32>
    %c20 = arith.constant 20 : index
    %c0_42 = arith.constant 0 : index
    %129 = vector.load %arg10[%c20, %c0_42] : memref<48x256xf32, #tpu.memory_space<vmem>>, vector<16x256xf32>
    %130 = vector.extract_strided_slice %42 {offsets = [18, 0], sizes = [1, 256], strides = [1, 1]} : vector<32x256xf32> to vector<1x256xf32>
    %131 = vector.broadcast %130 : vector<1x256xf32> to vector<16x256xf32>
    %132 = arith.mulf %129, %131 : vector<16x256xf32>
    %133 = arith.addf %113, %132 : vector<16x256xf32>
    %c21 = arith.constant 21 : index
    %c0_43 = arith.constant 0 : index
    %134 = vector.load %arg10[%c21, %c0_43] : memref<48x256xf32, #tpu.memory_space<vmem>>, vector<16x256xf32>
    %135 = vector.extract_strided_slice %42 {offsets = [19, 0], sizes = [1, 256], strides = [1, 1]} : vector<32x256xf32> to vector<1x256xf32>
    %136 = vector.broadcast %135 : vector<1x256xf32> to vector<16x256xf32>
    %137 = arith.mulf %134, %136 : vector<16x256xf32>
    %138 = arith.addf %118, %137 : vector<16x256xf32>
    %c22 = arith.constant 22 : index
    %c0_44 = arith.constant 0 : index
    %139 = vector.load %arg10[%c22, %c0_44] : memref<48x256xf32, #tpu.memory_space<vmem>>, vector<16x256xf32>
    %140 = vector.extract_strided_slice %42 {offsets = [20, 0], sizes = [1, 256], strides = [1, 1]} : vector<32x256xf32> to vector<1x256xf32>
    %141 = vector.broadcast %140 : vector<1x256xf32> to vector<16x256xf32>
    %142 = arith.mulf %139, %141 : vector<16x256xf32>
    %143 = arith.addf %123, %142 : vector<16x256xf32>
    %c23 = arith.constant 23 : index
    %c0_45 = arith.constant 0 : index
    %144 = vector.load %arg10[%c23, %c0_45] : memref<48x256xf32, #tpu.memory_space<vmem>>, vector<16x256xf32>
    %145 = vector.extract_strided_slice %42 {offsets = [21, 0], sizes = [1, 256], strides = [1, 1]} : vector<32x256xf32> to vector<1x256xf32>
    %146 = vector.broadcast %145 : vector<1x256xf32> to vector<16x256xf32>
    %147 = arith.mulf %144, %146 : vector<16x256xf32>
    %148 = arith.addf %128, %147 : vector<16x256xf32>
    %c24 = arith.constant 24 : index
    %c0_46 = arith.constant 0 : index
    %149 = vector.load %arg10[%c24, %c0_46] : memref<48x256xf32, #tpu.memory_space<vmem>>, vector<16x256xf32>
    %150 = vector.extract_strided_slice %42 {offsets = [22, 0], sizes = [1, 256], strides = [1, 1]} : vector<32x256xf32> to vector<1x256xf32>
    %151 = vector.broadcast %150 : vector<1x256xf32> to vector<16x256xf32>
    %152 = arith.mulf %149, %151 : vector<16x256xf32>
    %153 = arith.addf %133, %152 : vector<16x256xf32>
    %c25 = arith.constant 25 : index
    %c0_47 = arith.constant 0 : index
    %154 = vector.load %arg10[%c25, %c0_47] : memref<48x256xf32, #tpu.memory_space<vmem>>, vector<16x256xf32>
    %155 = vector.extract_strided_slice %42 {offsets = [23, 0], sizes = [1, 256], strides = [1, 1]} : vector<32x256xf32> to vector<1x256xf32>
    %156 = vector.broadcast %155 : vector<1x256xf32> to vector<16x256xf32>
    %157 = arith.mulf %154, %156 : vector<16x256xf32>
    %158 = arith.addf %138, %157 : vector<16x256xf32>
    %c26 = arith.constant 26 : index
    %c0_48 = arith.constant 0 : index
    %159 = vector.load %arg10[%c26, %c0_48] : memref<48x256xf32, #tpu.memory_space<vmem>>, vector<16x256xf32>
    %160 = vector.extract_strided_slice %42 {offsets = [24, 0], sizes = [1, 256], strides = [1, 1]} : vector<32x256xf32> to vector<1x256xf32>
    %161 = vector.broadcast %160 : vector<1x256xf32> to vector<16x256xf32>
    %162 = arith.mulf %159, %161 : vector<16x256xf32>
    %163 = arith.addf %143, %162 : vector<16x256xf32>
    %c27 = arith.constant 27 : index
    %c0_49 = arith.constant 0 : index
    %164 = vector.load %arg10[%c27, %c0_49] : memref<48x256xf32, #tpu.memory_space<vmem>>, vector<16x256xf32>
    %165 = vector.extract_strided_slice %42 {offsets = [25, 0], sizes = [1, 256], strides = [1, 1]} : vector<32x256xf32> to vector<1x256xf32>
    %166 = vector.broadcast %165 : vector<1x256xf32> to vector<16x256xf32>
    %167 = arith.mulf %164, %166 : vector<16x256xf32>
    %168 = arith.addf %148, %167 : vector<16x256xf32>
    %c28 = arith.constant 28 : index
    %c0_50 = arith.constant 0 : index
    %169 = vector.load %arg10[%c28, %c0_50] : memref<48x256xf32, #tpu.memory_space<vmem>>, vector<16x256xf32>
    %170 = vector.extract_strided_slice %42 {offsets = [26, 0], sizes = [1, 256], strides = [1, 1]} : vector<32x256xf32> to vector<1x256xf32>
    %171 = vector.broadcast %170 : vector<1x256xf32> to vector<16x256xf32>
    %172 = arith.mulf %169, %171 : vector<16x256xf32>
    %173 = arith.addf %153, %172 : vector<16x256xf32>
    %c29 = arith.constant 29 : index
    %c0_51 = arith.constant 0 : index
    %174 = vector.load %arg10[%c29, %c0_51] : memref<48x256xf32, #tpu.memory_space<vmem>>, vector<16x256xf32>
    %175 = vector.extract_strided_slice %42 {offsets = [27, 0], sizes = [1, 256], strides = [1, 1]} : vector<32x256xf32> to vector<1x256xf32>
    %176 = vector.broadcast %175 : vector<1x256xf32> to vector<16x256xf32>
    %177 = arith.mulf %174, %176 : vector<16x256xf32>
    %178 = arith.addf %158, %177 : vector<16x256xf32>
    %c30 = arith.constant 30 : index
    %c0_52 = arith.constant 0 : index
    %179 = vector.load %arg10[%c30, %c0_52] : memref<48x256xf32, #tpu.memory_space<vmem>>, vector<16x256xf32>
    %180 = vector.extract_strided_slice %42 {offsets = [28, 0], sizes = [1, 256], strides = [1, 1]} : vector<32x256xf32> to vector<1x256xf32>
    %181 = vector.broadcast %180 : vector<1x256xf32> to vector<16x256xf32>
    %182 = arith.mulf %179, %181 : vector<16x256xf32>
    %183 = arith.addf %163, %182 : vector<16x256xf32>
    %c31 = arith.constant 31 : index
    %c0_53 = arith.constant 0 : index
    %184 = vector.load %arg10[%c31, %c0_53] : memref<48x256xf32, #tpu.memory_space<vmem>>, vector<16x256xf32>
    %185 = vector.extract_strided_slice %42 {offsets = [29, 0], sizes = [1, 256], strides = [1, 1]} : vector<32x256xf32> to vector<1x256xf32>
    %186 = vector.broadcast %185 : vector<1x256xf32> to vector<16x256xf32>
    %187 = arith.mulf %184, %186 : vector<16x256xf32>
    %188 = arith.addf %168, %187 : vector<16x256xf32>
    %c32_54 = arith.constant 32 : index
    %c0_55 = arith.constant 0 : index
    %189 = vector.load %arg10[%c32_54, %c0_55] : memref<48x256xf32, #tpu.memory_space<vmem>>, vector<16x256xf32>
    %190 = vector.extract_strided_slice %42 {offsets = [30, 0], sizes = [1, 256], strides = [1, 1]} : vector<32x256xf32> to vector<1x256xf32>
    %191 = vector.broadcast %190 : vector<1x256xf32> to vector<16x256xf32>
    %192 = arith.mulf %189, %191 : vector<16x256xf32>
    %193 = arith.addf %173, %192 : vector<16x256xf32>
    %194 = arith.addf %183, %188 : vector<16x256xf32>
    %195 = arith.addf %193, %178 : vector<16x256xf32>
    %196 = arith.addf %194, %195 : vector<16x256xf32>
    %c0_56 = arith.constant 0 : index
    %c0_57 = arith.constant 0 : index
    %197 = vector.load %arg6[%c0_56, %c0_57] : memref<1x256xf32, #tpu.memory_space<vmem>>, vector<1x256xf32>
    %198 = vector.broadcast %197 : vector<1x256xf32> to vector<16x256xf32>
    %199 = arith.addf %196, %198 : vector<16x256xf32>
    %200 = arith.negf %199 : vector<16x256xf32>
    %201 = math.exp %200 : vector<16x256xf32>
    %cst_58 = arith.constant 1.000000e+00 : f32
    %202 = vector.broadcast %cst_58 : f32 to vector<16x256xf32>
    %203 = arith.addf %202, %201 : vector<16x256xf32>
    %204 = arith.divf %202, %203 : vector<16x256xf32>
    %205 = arith.mulf %199, %204 : vector<16x256xf32>
    %206 = arith.truncf %205 : vector<16x256xf32> to vector<16x256xbf16>
    %c0_59 = arith.constant 0 : index
    %c0_60 = arith.constant 0 : index
    %207 = vector.load %arg7[%c0_59, %c0_60] : memref<256x128xbf16, #tpu.memory_space<vmem>>, vector<256x128xbf16>
    %cst_61 = arith.constant dense<0.000000e+00> : vector<16x128xf32>
    %208 = tpu.matmul %206, %207, %cst_61 {dimension_numbers = #tpu.dot_dimension_numbers<[1], [0], [0], [1], [0, 0, 1, 1], [], []>} : vector<16x256xbf16>, vector<256x128xbf16>, vector<16x128xf32> -> vector<16x128xf32>
    %c0_62 = arith.constant 0 : index
    %c0_63 = arith.constant 0 : index
    %209 = vector.load %arg8[%c0_62, %c0_63] : memref<1x128xf32, #tpu.memory_space<vmem>>, vector<1x128xf32>
    %210 = vector.broadcast %209 : vector<1x128xf32> to vector<16x128xf32>
    %211 = arith.addf %208, %210 : vector<16x128xf32>
    %212 = arith.addf %4, %211 : vector<16x128xf32>
    %c0_64 = arith.constant 0 : index
    %c0_65 = arith.constant 0 : index
    %c0_66 = arith.constant 0 : index
    %213 = vector.load %arg9[%c0_64, %c0_65, %c0_66] : memref<1x16x128xf32, #tpu.memory_space<vmem>>, vector<1x16x128xf32>
    %214 = vector.shape_cast %213 : vector<1x16x128xf32> to vector<16x128xf32>
    %215 = vector.shape_cast %212 : vector<16x128xf32> to vector<1x16x128xf32>
    tpu.vector_store %arg9[%c0_64, %c0_65, %c0_66], %215 {strides = array<i32>} : memref<1x16x128xf32, #tpu.memory_space<vmem>>, vector<1x16x128xf32>,
    return
  }
  func.func @transform_0(%arg0: i32, %arg1: i32) -> (i32, i32, i32) {
    %c0_i32 = arith.constant 0 : i32
    %c0_i32_0 = arith.constant 0 : i32
    return %arg0, %arg1, %c0_i32 : i32, i32, i32
  }
  func.func @transform_1(%arg0: i32, %arg1: i32) -> (i32, i32) {
    %c0_i32 = arith.constant 0 : i32
    %c0_i32_0 = arith.constant 0 : i32
    %c0_i32_1 = arith.constant 0 : i32
    return %c0_i32, %c0_i32_0 : i32, i32
  }
  func.func @transform_2(%arg0: i32, %arg1: i32) -> (i32, i32) {
    %c0_i32 = arith.constant 0 : i32
    %c0_i32_0 = arith.constant 0 : i32
    %c0_i32_1 = arith.constant 0 : i32
    return %c0_i32, %c0_i32_0 : i32, i32
  }
  func.func @transform_3(%arg0: i32, %arg1: i32) -> (i32, i32) {
    %c0_i32 = arith.constant 0 : i32
    %c0_i32_0 = arith.constant 0 : i32
    %c0_i32_1 = arith.constant 0 : i32
    return %c0_i32, %c0_i32_0 : i32, i32
  }
  func.func @transform_4(%arg0: i32, %arg1: i32) -> (i32, i32) {
    %c0_i32 = arith.constant 0 : i32
    %c0_i32_0 = arith.constant 0 : i32
    %c0_i32_1 = arith.constant 0 : i32
    return %c0_i32, %c0_i32_0 : i32, i32
  }
  func.func @transform_5(%arg0: i32, %arg1: i32) -> (i32, i32) {
    %c0_i32 = arith.constant 0 : i32
    %c0_i32_0 = arith.constant 0 : i32
    %c0_i32_1 = arith.constant 0 : i32
    return %c0_i32, %c0_i32_0 : i32, i32
  }
  func.func @transform_6(%arg0: i32, %arg1: i32) -> (i32, i32) {
    %c0_i32 = arith.constant 0 : i32
    %c0_i32_0 = arith.constant 0 : i32
    %c0_i32_1 = arith.constant 0 : i32
    return %c0_i32, %c0_i32_0 : i32, i32
  }
  func.func @transform_7(%arg0: i32, %arg1: i32) -> (i32, i32, i32) {
    %c0_i32 = arith.constant 0 : i32
    %c0_i32_0 = arith.constant 0 : i32
    return %arg0, %arg1, %c0_i32 : i32, i32, i32
  }
}

</mosaic_0001>

<bundles_post_ra>
// kernel: tpu_custom_call.1
= control target key start
LH: loop header
LB: loop body
LE: loop exit
PB: predicated region body
PF: predicated region fallthrough
CT: control target
= control target key end

     0   :  { %s3876_s0 = inlined_call_operand.hbm [shape: f32[2,16,128], index: 0, kind: input, shape index: {}]   ;;  %s3877_s1 = inlined_call_operand.hbm [shape: bf16[128,512], index: 1, kind: input, shape index: {}]   ;;  %s3878_s2 = inlined_call_operand.hbm [shape: f32[1,512], index: 2, kind: input, shape index: {}]   ;;  %s3879_s3 = inlined_call_operand.hbm [shape: f32[32,256], index: 3, kind: input, shape index: {}]   ;;  %s3880_s4 = inlined_call_operand.vmem [shape: f32[1,256], index: 4, kind: input, shape index: {}]   ;;  %s3881_s5 = inlined_call_operand.hbm [shape: bf16[256,128], index: 5, kind: input, shape index: {}]   ;;  %s3882_s6 = inlined_call_operand.vmem [shape: f32[1,128], index: 6, kind: input, shape index: {}]   ;;  %s3883_s7 = inlined_call_operand.hbm [shape: f32[2,16,128], index: 7, kind: output, shape index: {}]  }
   0x1   :  { %3945 = sst [smem:[#allocation69_spill]] %s3877_s1 }
   0x2   :  { %3946 = sst [smem:[#allocation70_spill]] %s3878_s2 }
   0x3   :  { %3947 = sst [smem:[#allocation71_spill]] %s3879_s3 }
   0x4   :  { %12 = vsyncpa [#allocation5], 0 }
   0x5   :  { %14 = vsyncpa [#allocation5 + $0x1], 0 }
   0x6   :  { %15 = vsyncpa [#allocation8], 0 }
   0x7   :  { %16 = vsyncpa [#allocation11], 0 }
   0x8   :  { %17 = vsyncpa [#allocation6], 0 }
   0x9   :  { %19 = vsyncpa [#allocation6 + $0x1], 0  ;;  %s2891_s24 = smov 0   ;;  %s2893_s25 = smov 0  }
   0xa   :  { %s2895_s26 = smov 0   ;;  %s2897_s27 = smov 0  }
   0xb   :  { %s2899_s28 = smov 0   ;;  %s2901_s29 = smov 0  }
   0xc LB: > { %s2283_s30 = sadd.s32 4294967295, %s2833_s29   ;;  %s2284_s8 = sadd.s32 4294967294, %s2833_s29   ;;  %s2833_s29 = sphi %s2901_s29, %s25_s29   ;;  %s2829_s28 = sphi %s2899_s28, %s4096_s28   ;;  %s2825_s27 = sphi %s2897_s27, %s4095_s27   ;;  %s2821_s26 = sphi %s2895_s26, %s4094_s26   ;;  %s2817_s25 = sphi %s2893_s25, %s4093_s25   ;;  %s2813_s24 = sphi %s2891_s24, %s4092_s24  }
   0xd   : > { %p59_p0 = scmp.ne.s32.totalorder %s2817_s25, %s2813_s24  ;;  %p2925_p1 = scmp.eq.s32.totalorder %s2283_s30, 0 }
   0xe   : > { %p2929_p2 = scmp.eq.s32.totalorder %s2283_s30, 1  ;;  %p217_p3 = scmp.eq.s32.totalorder %s2284_s8, 1 }
   0xf   : > { %s3948_s9 = scalar_select %p2925_p1, 1, 0 }
  0x10   : > { %p2935_p4 = por %p2925_p1, %p59_p0  ;;  %p2285_p5 = scmp.ge.s32.totalorder %s2833_s29, 1 }
  0x11   : > { %p2940_p6 = por %p217_p3, %p59_p0  ;;  %p224_p7 = scmp.lt.s32.totalorder %s2833_s29, 3 }
  0x12   : > { %s3950_s11 = scalar_select %p2935_p4, 1, 0 }
  0x13   : > { %s3951_s12 = scalar_select %p2940_p6, 1, 0 }
  0x14   : > { %p2945_p8 = pnand %p2285_p5, %p224_p7  ;;  %s2835_s14 = smov [#allocation7]  }
  0x15   : > { %s236_s15 = sshll.u32 %s2835_s14, 4  ;;  %s2836_s17 = smov [#allocation10]   ;;  %s237_s15 = int_to_ptr.vmem [resolvable:$true] %s236_s15 }
  0x16   : > { %s3952_s13 = scalar_select %p2945_p8, 1, 0 }
  0x17   : > { %p2409_p9 = pneg %p2945_p8  ;;  %s260_s18 = sshll.u32 %s2836_s17, 4  ;;  %s261_s18 = int_to_ptr.vmem [resolvable:$true] %s260_s18 }
  0x18   : > { %s2837_s19 = smov [#allocation9]   ;;  %s2624_s21 = scalar_lea.vmem %s237_s15, 4096 }
  0x19   : > { %p2954_p11 = pnand %p2409_p9, %p2925_p1  ;;  %s250_s20 = sshll.u32 %s2837_s19, 4  ;;  %s251_s20 = int_to_ptr.vmem [resolvable:$true] %s250_s20 }
  0x1a   : > { %p2625_p13 = scmp.ne.s32.totalorder %s237_s15, %s2624_s21  ;;  %p2632_p5 = scmp.lt.s32.totalorder %s237_s15, %s237_s15 }
  0x1b   : > { %p2615_p12 = pneg %p2954_p11  ;;  %p2633_p7 = scmp.lt.s32.totalorder %s2624_s21, %s2624_s21 }
  0x1d   : > { %p2627_p0 = pnand %p2625_p13, %p2615_p12  ;;  %p2634_p9 = por %p2633_p7, %p2632_p5 }
  0x1f   : > { %p2628_p3 = pneg %p2627_p0 }
  0x21   : > { %p2635_p10 = pnand %p2634_p9, %p2628_p3 }
  0x23   : > { %2638 = shalt.err (!%p2635_p10)
}
  0x24   : > { %s2838_s22 = smov 256   ;;  %s2839_s23 = smov 16  }
  0x25   : > { %s3954_s1 = sld [smem:[#allocation69_spill]]  ;;  %s2650_s14 = scalar_lea.vmem %s261_s18, 1024 }
  0x26   : > { %p2651_p6 = scmp.ne.s32.totalorder %s261_s18, %s2650_s14  ;;  %p2658_p1 = scmp.lt.s32.totalorder %s261_s18, %s261_s18 }
  0x27   : > { %p2659_p4 = scmp.lt.s32.totalorder %s2650_s14, %s2650_s14 }
  0x28   : > { %p2653_p13 = pnand %p2651_p6, %p2615_p12 }
  0x29   : > { %p2660_p5 = por %p2659_p4, %p2658_p1 }
  0x2a   : > { %p2654_p0 = pneg %p2653_p13 }
  0x2b   : > { %2412 = dma.hbm_to_vmem [thread:$0]  (!%p2954_p11), %s3954_s1, 4096, %s237_s15, [#allocation8], %s2838_s22, %s2838_s22, %s2839_s23  }
  0x2c   : > { %p2661_p3 = pnand %p2660_p5, %p2654_p0 }
  0x2e   : > { %2664 = shalt.err (!%p2661_p3)
}
  0x2f   : > { %s3955_s3 = sld [smem:[#allocation71_spill]]  ;;  %s2676_s15 = scalar_lea.vmem %s251_s20, 64 }
  0x30   : > { %p2677_p10 = scmp.ne.s32.totalorder %s251_s20, %s2676_s15  ;;  %p2684_p9 = scmp.lt.s32.totalorder %s251_s20, %s251_s20 }
  0x31   : > { %p2685_p13 = scmp.lt.s32.totalorder %s2676_s15, %s2676_s15 }
  0x32   : > { %p2679_p7 = pnand %p2677_p10, %p2615_p12 }
  0x33   : > { %p2686_p8 = por %p2685_p13, %p2684_p9 }
  0x34   : > { %p2680_p6 = pneg %p2679_p7 }
  0x35   : > { %2418 = dma.hbm_to_vmem [thread:$0]  (!%p2954_p11), %s3955_s3, 1024, %s261_s18, [#allocation11], %s2838_s22, %s2838_s22, %s2839_s23  }
  0x36   : > { %p2687_p1 = pnand %p2686_p8, %p2680_p6 }
  0x38   : > { %2690 = shalt.err (!%p2687_p1)
}
  0x39   : > { %s3956_s2 = sld [smem:[#allocation70_spill]]  ;;  %s2840_s18 = smov [#allocation12]  }
  0x3a   : > { %s276_s22 = sshll.u32 %s2840_s18, 4  ;;  %s277_s22 = int_to_ptr.vmem [resolvable:$true] %s276_s22 }
  0x3b   : > { %s2702_s23 = scalar_lea.vmem %s277_s22, 2048  ;;  %p2710_p3 = scmp.lt.s32.totalorder %s277_s22, %s277_s22 }
  0x3c   : > { %p2703_p4 = scmp.ne.s32.totalorder %s277_s22, %s2702_s23  ;;  %p2711_p10 = scmp.lt.s32.totalorder %s2702_s23, %s2702_s23 }
  0x3e   : > { %p2705_p0 = pnand %p2703_p4, %p2615_p12  ;;  %p2712_p8 = por %p2711_p10, %p2710_p3 }
  0x3f   : > { %2415 = dma.hbm_to_vmem [thread:$0]  (!%p2954_p11), %s3956_s2, 64, %s251_s20, [#allocation8]  }
  0x40   : > { %p2706_p5 = pneg %p2705_p0 }
  0x42   : > { %p2713_p7 = pnand %p2712_p8, %p2706_p5 }
  0x44   : > { %2716 = shalt.err (!%p2713_p7)
}
  0x45   : > { %s2841_s8 = smov 64   ;;  %s2842_s20 = smov 4  }
  0x46   : > { %2421 = dma.hbm_to_vmem [thread:$0]  (!%p2954_p11), %s3881_s5, 2048, %s277_s22, [#allocation11], %s2841_s8, %s2841_s8, %s2842_s20  }
  0x47   : > { %s37_s19 = sadd.s32 1, %s2829_s28  ;;  %s46_s15 = sadd.s32 1, %s2821_s26 }
  0x48   : > { %p39_p12 = scmp.ge.s32.totalorder %s37_s19, 2  ;;  %p53_p6 = scmp.ne.s32.totalorder %s2821_s26, %s2817_s25 }
  0x49   : > { %p54_p9 = scmp.eq.s32.totalorder %s2833_s29, 0  ;;  %p2434_p13 = scmp.lt.s32.totalorder %s2833_s29, 2 }
  0x4a   : > { %s4098_s19 = smov (%p39_p12, %s37_s19), 0  ;;  %p3002_p4 = por %p2929_p2, %p53_p6 }
  0x4b   : > { %p55_p1 = por %p54_p9, %p53_p6  ;;  %s41_s16 = ssub.s32 %s2829_s28, %s4098_s19 }
  0x4c   : > { %s293_s30 = sand.u32 1, %s2821_s26   ;;  %p44_p0 = scmp.eq.s32.totalorder %s41_s16, 0 }
  0x4d   : > { %s2291_s18 = sshll.u32 %s293_s30, 4  ;;  %s2365_s22 = sshll.u32 %s2829_s28, 8 }
  0x4e   : > { %s3011_s23 = scalar_select %p44_p0, %s2821_s26, %s46_s15  }
  0x4f   : > { %s305_s14 = scalar_lea.hbm %s3876_s0, %s2365_s22  ;;  %s297_s17 = scalar_lea.vmem [#allocation4], %s2291_s18 }
  0x50   : > { %s306_s1 = sshll.u32 %s297_s17, 4  ;;  %p3018_p11 = pnand %p2434_p13, %p55_p1  ;;  %s307_s1 = int_to_ptr.vmem [resolvable:$true] %s306_s1 }
  0x51   : > { %s294_s2 = scalar_lea.sflag [#allocation5], %s293_s30  ;;  %s2730_s16 = scalar_lea.vmem %s307_s1, 256 }
  0x52   : > { %p2719_p2 = pneg %p3018_p11  ;;  %p2731_p5 = scmp.ne.s32.totalorder %s307_s1, %s2730_s16 }
  0x53   : > { %s2843_s15 = smov [#allocation4]  }
  0x54   : > { %p2733_p3 = pnand %p2731_p5, %p2719_p2  ;;  %s2735_s3 = sshll.u32 %s2843_s15, 4  ;;  %s2736_s3 = int_to_ptr.vmem [resolvable:$false] %s2735_s3 }
  0x55   : > { %s2737_s22 = scalar_lea.vmem %s2736_s3, 512  ;;  %p2738_p8 = scmp.lt.s32.totalorder %s307_s1, %s2736_s3 }
  0x56   : > { %p2734_p10 = pneg %p2733_p3  ;;  %p2739_p7 = scmp.lt.s32.totalorder %s2737_s22, %s2730_s16 }
  0x58   : > { %p2740_p12 = por %p2739_p7, %p2738_p8 }
  0x5a   : > { %p2741_p6 = pnand %p2740_p12, %p2734_p10 }
  0x5c   : > { %2744 = shalt.err (!%p2741_p6)
}
  0x5d   : > { %s2844_s18 = smov 128   ;;  %s2845_s8 = smov 8  }
  0x5e   : > { %2425 = dma.hbm_to_vmem [thread:$0]  (!%p3018_p11), %s305_s14, 256, %s307_s1, %s294_s2, %s2844_s18, %s2844_s18, %s2845_s8  }
  0x5f   : > { %p3959_p9 = scmp.ne.s32.totalorder %s3952_s13, 0 }
  0x61   : > { %318 = sbr.rel (%p3959_p9) target bundleno = 977 (0x3d1), region = 48 }
  0x66   : > { %s3029_s30 = sand.u32 1, %s2817_s25   ;;  %p3960_p13 = scmp.ne.s32.totalorder %s3950_s11, 0 }
  0x67   : > { %s2295_s3 = sshll.u32 %s3029_s30, 4  ;;  %s321_s20 = scalar_lea.sflag [#allocation5], %s3029_s30 }
  0x68   : > { %s3035_s17 = scalar_lea.vmem [#allocation4], %s2295_s3 }
  0x69   : > { %2796 = dma.done.wait (%p3960_p13), %s321_s20, 256  }
  0x6a   : > { %2798 = vsyncadd (%p3960_p13), %s321_s20, 4294967040  ;;  %p3961_p1 = scmp.ne.s32.totalorder %s3948_s9, 0 }
  0x6c   : > { %2800 = dma.done.wait (%p3961_p1), [#allocation8], 4160  }
  0x6d   : > { %2802 = vsyncadd (%p3961_p1), [#allocation8], 4294963136 }
  0x6e   : > { %2804 = dma.done.wait (%p3961_p1), [#allocation11], 3072  }
  0x6f   : > { %2806 = vsyncadd (%p3961_p1), [#allocation11], 4294964224  ;;  %v386_v0 = vld [vmem:[%s3035_s17] sm:$0xff]  ;;  %v387_v1 = vld [vmem:[%s3035_s17 + $0x8] sm:$0xff]  ;;  %v2846_v36 = vmov 0   ;;  %v2847_v54 = vmov 0.0   ;;  %v446_v60 = vlaneseq }
  0x70   : > { %388 = vadd.xlane.f32.xlu0 %v386_v0  ;;  %v2502_v2 = vld [vmem:[#allocation7 + $0xe4] ss:$16 sps:$4 sm:$0xff]   ;;  %v2504_v3 = vld [vmem:[#allocation7 + $0xec] ss:$16 sps:$4 sm:$0xff]   ;;  %v2506_v4 = vld [vmem:[#allocation7 + $0xe0] ss:$16 sps:$4 sm:$0xff]   ;;  %658 = vmatprep.mubr.bf16.mxu0 %v2846_v36 }
  0x71   : > { %v2507_v5 = vld [vmem:[#allocation7 + $0xe8] ss:$16 sps:$4 sm:$0xff]   ;;  %v2508_v6 = vld [vmem:[#allocation7 + $0xc4] ss:$16 sps:$4 sm:$0xff]   ;;  %v2510_v7 = vld [vmem:[#allocation7 + $0xcc] ss:$16 sps:$4 sm:$0xff]   ;;  %626 = vmatprep.subr.bf16.mxu0 %v2502_v2  ;;  %669 = vmatprep.subr.bf16.mxu1 %v2504_v3 }
  0x72   : > { %v2512_v8 = vld [vmem:[#allocation7 + $0xc0] ss:$16 sps:$4 sm:$0xff]   ;;  %627 = vmatpush1.bf16.msra.mxu0 %v2506_v4  ;;  %670 = vmatpush1.bf16.msra.mxu1 %v2507_v5  ;;  %v2513_v9 = vld [vmem:[#allocation7 + $0xc8] ss:$16 sps:$4 sm:$0xff]   ;;  %v2514_v18 = vld [vmem:[#allocation7 + $0xa4] ss:$16 sps:$4 sm:$0xff]  }
  0x73   : > { %628 = vmatprep.subr.bf16.mxu0 %v2508_v6  ;;  %671 = vmatprep.subr.bf16.mxu1 %v2510_v7  ;;  %v2516_v19 = vld [vmem:[#allocation7 + $0xac] ss:$16 sps:$4 sm:$0xff]   ;;  %v2518_v20 = vld [vmem:[#allocation7 + $0xa0] ss:$16 sps:$4 sm:$0xff]   ;;  %v2519_v21 = vld [vmem:[#allocation7 + $0xa8] ss:$16 sps:$4 sm:$0xff]  }
  0x74   : > { %390 = vadd.xlane.f32.xlu0 %v387_v1  ;;  %v2520_v22 = vld [vmem:[#allocation7 + $0x84] ss:$16 sps:$4 sm:$0xff]   ;;  %v2522_v23 = vld [vmem:[#allocation7 + $0x8c] ss:$16 sps:$4 sm:$0xff]   ;;  %v2524_v24 = vld [vmem:[#allocation7 + $0x80] ss:$16 sps:$4 sm:$0xff]   ;;  %701 = vmatprep.mubr.bf16.mxu1 %v2846_v36 }
  0x75   : > { %v2525_v25 = vld [vmem:[#allocation7 + $0x88] ss:$16 sps:$4 sm:$0xff]   ;;  %v2526_v26 = vld [vmem:[#allocation7 + $0x64] ss:$16 sps:$4 sm:$0xff]   ;;  %v2528_v27 = vld [vmem:[#allocation7 + $0x6c] ss:$16 sps:$4 sm:$0xff]  }
  0x76   : > { %629 = vmatpush1.bf16.msra.mxu0 %v2512_v8  ;;  %672 = vmatpush1.bf16.msra.mxu1 %v2513_v9  ;;  %v2530_v28 = vld [vmem:[#allocation7 + $0x60] ss:$16 sps:$4 sm:$0xff]   ;;  %v2531_v29 = vld [vmem:[#allocation7 + $0x68] ss:$16 sps:$4 sm:$0xff]   ;;  %v2532_v30 = vld [vmem:[#allocation7 + $0x44] ss:$16 sps:$4 sm:$0xff]  }
  0x77   : > { %630 = vmatprep.subr.bf16.mxu0 %v2514_v18  ;;  %673 = vmatprep.subr.bf16.mxu1 %v2516_v19  ;;  %v2534_v31 = vld [vmem:[#allocation7 + $0x4c] ss:$16 sps:$4 sm:$0xff]   ;;  %v2536_v32 = vld [vmem:[#allocation7 + $0x40] ss:$16 sps:$4 sm:$0xff]   ;;  %v2537_v33 = vld [vmem:[#allocation7 + $0x48] ss:$16 sps:$4 sm:$0xff]  }
  0x78   : > { %v2538_v34 = vld [vmem:[#allocation7 + $0x24] ss:$16 sps:$4 sm:$0xff]   ;;  %v2540_v35 = vld [vmem:[#allocation7 + $0x2c] ss:$16 sps:$4 sm:$0xff]   ;;  %v2542_v37 = vld [vmem:[#allocation7 + $0x20] ss:$16 sps:$4 sm:$0xff]  }
  0x79   : > { %v2543_v38 = vld [vmem:[#allocation7 + $0x28] ss:$16 sps:$4 sm:$0xff]   ;;  %v2544_v39 = vld [vmem:[#allocation7 + $0x4] ss:$16 sps:$4 sm:$0xff]   ;;  %v2546_v40 = vld [vmem:[#allocation7 + $0xc] ss:$16 sps:$4 sm:$0xff]  }
  0x7a   : > { %631 = vmatpush1.bf16.msra.mxu0 %v2518_v20  ;;  %674 = vmatpush1.bf16.msra.mxu1 %v2519_v21  ;;  %v2548_v41 = vld [vmem:[#allocation7] ss:$16 sps:$4 sm:$0xff]   ;;  %v2549_v42 = vld [vmem:[#allocation7 + $0x8] ss:$16 sps:$4 sm:$0xff]   ;;  %749 = vst [vmem:[#allocation2] sm:$0xff] %v2847_v54  ;;  %751 = vst [vmem:[#allocation2 + $0x18] sm:$0xff] %v2847_v54 }
  0x7b   : > { %632 = vmatprep.subr.bf16.mxu0 %v2520_v22  ;;  %675 = vmatprep.subr.bf16.mxu1 %v2522_v23  ;;  %753 = vst [vmem:[#allocation2 + $0x20] sm:$0xff] %v2847_v54  ;;  %755 = vst [vmem:[#allocation2 + $0x38] sm:$0xff] %v2847_v54  ;;  %v2550_v55 = vld [vmem:[#allocation12 + $0x78] sm:$0xff]   ;;  %v2552_v57 = vld [vmem:[#allocation12 + $0x70] sm:$0xff]   ;;  %v447_v63 = vshrl.u32 %v446_v60, 7  ;;  %vm882_vm0 = vcmask 1043456  }
  0x7c   : > { %748 = vst [vmem:[#allocation2 + $0x30] sm:$0xff] %v2847_v54  ;;  %750 = vst [vmem:[#allocation2 + $0x58] sm:$0xff] %v2847_v54  ;;  %v2551_v56 = vld [vmem:[#allocation12 + $0x38] sm:$0xff]   ;;  %v2553_v58 = vld [vmem:[#allocation12 + $0x30] sm:$0xff]   ;;  %vm1805_vm1 = vcmask 1046528   ;;  %vm1862_vm2 = vcmask 1045504  }
  0x7d   : > { %752 = vst [vmem:[#allocation2 + $0x50] sm:$0xff] %v2847_v54  ;;  %754 = vst [vmem:[#allocation2 + $0x8] sm:$0xff] %v2847_v54  ;;  %v2554_v59 = vld [vmem:[#allocation12 + $0x68] sm:$0xff]   ;;  %v2556_v62 = vld [vmem:[#allocation12 + $0x60] sm:$0xff]   ;;  %v3061_v2 = vsub.s32 4, %v447_v63  ;;  %v3063_v5 = vsub.s32 5, %v447_v63 }
  0x7e   : > { %633 = vmatpush1.bf16.msra.mxu0 %v2524_v24  ;;  %676 = vmatpush1.bf16.msra.mxu1 %v2525_v25  ;;  %v2555_v61 = vld [vmem:[#allocation12 + $0x28] sm:$0xff]   ;;  %v2559_v4 = vld [vmem:[#allocation12 + $0x18] sm:$0xff]   ;;  %v2560_v6 = vld [vmem:[#allocation12 + $0x50] sm:$0xff]   ;;  %v3066_v8 = vsub.s32 6, %v447_v63  ;;  %v3076_v18 = vsub.s32 2, %v447_v63  ;;  %v3078_v19 = vsub.s32 7, %v447_v63 }
  0x7f   : > { %634 = vmatprep.subr.bf16.mxu0 %v2526_v26  ;;  %677 = vmatprep.subr.bf16.mxu1 %v2528_v27  ;;  %v777_v3 = vld [vmem:[#allocation10 + $0x8] sm:$0xff]  ;;  %v3090_v26 = vsub.s32 1, %v447_v63  ;;  %v2564_v27 = vld [vmem:[#allocation12 + $0x40] sm:$0xff]   ;;  %s370_s13 = scalar_lea.vmem [#allocation13], %s2295_s3  ;;  %s2366_s10 = sshll.u32 %s2825_s27, 8 }
  0x80   : > { %v869_v7 = vrot.slane %v777_v3, %v3061_v2  ;;  %v2563_v20 = vld [vmem:[#allocation12 + $0x8] sm:$0xff]   ;;  %v3084_v23 = vrot.slane %v777_v3, %v3076_v18  ;;  %s2158_s14 = sshll.u32 %s370_s13, 4  ;;  %s3827_s22 = scalar_lea.hbm %s3883_s7, %s2366_s10  ;;  %s3822_s14 = int_to_ptr.vmem [resolvable:$true] %s2158_s14 }
  0x81   : > { %v859_v9 = vld [vmem:[#allocation2] sm:$0xc0]  ;;  %v3099_v36 = vrot.slane %v777_v3, %v3090_v26  ;;  %s2143_s18 = scalar_lea.sflag [#allocation6], %s3029_s30  ;;  %s2745_s8 = scalar_lea.vmem %s3822_s14, 256 }
  0x82   : > { %635 = vmatpush1.bf16.msra.mxu0 %v2530_v28  ;;  %678 = vmatpush1.bf16.msra.mxu1 %v2531_v29  ;;  %v823_v22 = vld [vmem:[#allocation2] sm:$0xf0]  ;;  %p2746_p0 = scmp.ne.s32.totalorder %s3822_s14, %s2745_s8  ;;  %s2848_s27 = smov [#allocation13]  }
  0x83   : > { %636 = vmatprep.subr.bf16.mxu0 %v2532_v30  ;;  %679 = vmatprep.subr.bf16.mxu1 %v2534_v31  ;;  %v785_v28 = vld [vmem:[#allocation2] sm:$0xfc]  ;;  %s2749_s3 = sshll.u32 %s2848_s27, 4  ;;  %s2750_s3 = int_to_ptr.vmem [resolvable:$false] %s2749_s3 }
  0x84   : > { %p2747_p11 = pnand %p2746_p0, %p3002_p4  ;;  %s2751_s20 = scalar_lea.vmem %s2750_s3, 512 }
  0x85   : > { %p2752_p5 = scmp.lt.s32.totalorder %s3822_s14, %s2750_s3  ;;  %p2753_p3 = scmp.lt.s32.totalorder %s2751_s20, %s2745_s8 }
  0x86   : > { %637 = vmatpush1.bf16.msra.mxu0 %v2536_v32  ;;  %680 = vmatpush1.bf16.msra.mxu1 %v2537_v33  ;;  %v3093_v32 = vld [vmem:[#allocation10 + $0x18] sm:$0xff]  ;;  %v998_v33 = vrot.slane %v777_v3, %v3078_v19  ;;  %p2748_p2 = pneg %p2747_p11 }
  0x87   : > { %638 = vmatprep.subr.bf16.mxu0 %v2538_v34  ;;  %681 = vmatprep.subr.bf16.mxu1 %v2540_v35  ;;  %v444_v34 = vld [vmem:[#allocation9] sm:$0xf]  ;;  %v3096_v35 = vsub.s32 3, %v447_v63  ;;  %p2754_p10 = por %p2753_p3, %p2752_p5 }
  0x89   : > { %p2755_p8 = pnand %p2754_p10, %p2748_p2 }
  0x8a   : > { %639 = vmatpush1.bf16.msra.mxu0 %v2542_v37  ;;  %682 = vmatpush1.bf16.msra.mxu1 %v2543_v38  ;;  %v988_v37 = vld [vmem:[#allocation2 + $0x18] sm:$0xfe]  ;;  %v2565_v38 = vld [vmem:[#allocation12] sm:$0xff]  }
  0x8b   : > { %640 = vmatprep.subr.bf16.mxu0 %v2544_v39  ;;  %683 = vmatprep.subr.bf16.mxu1 %v2546_v40  ;;  %v805_v40 = vld [vmem:[#allocation2] sm:$0xf8] }
  0x8e   : > { %641 = vmatpush1.bf16.msra.mxu0 %v2548_v41  ;;  %684 = vmatpush1.bf16.msra.mxu1 %v2549_v42  ;;  %v835_v41 = vmul.f32 %v3084_v23, %v823_v22  ;;  %v789_v22 = vld [vmem:[#allocation2 + $0x20] sm:$0x3] }
  0x8f   : > { %2367 = vmatprep.subr.bf16.mxu0 %v2550_v55  ;;  %v3126_v55 = vrot.slane %v444_v34, %v3076_v18 }
  0xf9   : > { %v389_v10 = vpop.xlane.xlu0 %388 }
  0xfa   : > { %v393_v11 = vmul.f32 0.0078125, %v389_v10  ;;  %v2561_v10 = vld [vmem:[#allocation12 + $0x10] sm:$0xff]  }
  0xfc   : > { %v3051_v12 = vsub.f32 %v386_v0, %v393_v11  ;;  %v2557_v0 = vld [vmem:[#allocation12 + $0x20] sm:$0xff]   ;;  %v3069_v11 = vrot.slane %v777_v3, %v3063_v5 }
  0xfd   : > { %v391_v13 = vpop.xlane.xlu0 %390 }
  0xfe   : > { %v394_v14 = vmul.f32 0.0078125, %v391_v13  ;;  %v397_v15 = vmul.f32 %v3051_v12, %v3051_v12  ;;  %v871_v13 = vmul.f32 %v869_v7, %v859_v9  ;;  %v3088_v25 = vmul.f32 0.0, %v3069_v11 }
 0x100   : > { %v3055_v16 = vsub.f32 %v387_v1, %v394_v14  ;;  %399 = vadd.xlane.f32.xlu1 %v397_v15  ;;  %v2558_v1 = vld [vmem:[#allocation12 + $0x58] sm:$0xff]   ;;  %v3071_v14 = vmul.f32 0.0, %v869_v7  ;;  %v906_v15 = vld [vmem:[#allocation2] sm:$0x80]  ;;  %v886_v29 = vrot.slane %v871_v13, 4  ;;  %v3146_v13 = vrot.slane %v444_v34, %v3096_v35 }
 0x101   : > { %v918_v24 = vmul.f32 %v3069_v11, %v906_v15  ;;  %v3150_v15 = vrot.slane %v3093_v32, %v3096_v35 }
 0x102   : > { %v398_v17 = vmul.f32 %v3055_v16, %v3055_v16  ;;  %v887_v30 = vrot.slane %v3071_v14, 4  ;;  %v1186_v14 = vrot.slane %v3093_v32, %v3063_v5 }
 0x103   : > { %v932_v42 = vrot.slane %v918_v24, 4 }
 0x104   : > { %401 = vadd.xlane.f32.xlu1 %v398_v17  ;;  %v3074_v17 = vsub.s32 0, %v447_v63 }
 0x106   : > { %3962 = vst [vmem:[#allocation18_spill] sm:$0xff] %v3074_v17  ;;  %v3081_v21 = vrot.slane %v777_v3, %v3074_v17  ;;  %v3123_v54 = vrot.slane %v444_v34, %v3074_v17 }
 0x108   : > { %v799_v39 = vmul.f32 %v3081_v21, %v785_v28 }
 0x189   : > { %v400_v43 = vpop.xlane.xlu1 %399 }
 0x18a   : > { %v403_v44 = vmul.f32 0.0078125, %v400_v43  ;;  %v933_v43 = vrot.slane %v3088_v25, 4  ;;  %v1190_v25 = vmul.f32 0.0, %v1186_v14 }
 0x18c   : > { %v405_v45 = vadd.f32 1e-05, %v403_v44  ;;  %v3105_v44 = vrot.slane %v777_v3, %v3096_v35  ;;  %v934_v60 = vsel %vm882_vm0, %v932_v42, %v933_v43 }
 0x18d   : > { %v402_v46 = vpop.xlane.xlu1 %401 }
 0x18e   : > { %v404_v47 = vmul.f32 0.0078125, %v402_v46  ;;  %2566 = vrsqrt.f32 %v405_v45  ;;  %v861_v45 = vld [vmem:[#allocation2 + $0x20] sm:$0x3f]  ;;  %v888_v46 = vsel %vm882_vm0, %v886_v29, %v887_v30  ;;  %v855_v24 = vmul.f32 0.0, %v3105_v44 }
 0x190   : > { %v406_v48 = vadd.f32 1e-05, %v404_v47 }
 0x192   : > { %2568 = vrsqrt.f32 %v406_v48  ;;  %v3114_v48 = vrot.slane %v3093_v32, %v3076_v18 }
 0x19b   : > { %v2567_v49 = vpop.eup %2566 }
 0x19c   : > { %v409_v51 = vmul.f32 %v2567_v49, %v3051_v12  ;;  %v2562_v12 = vld [vmem:[#allocation12 + $0x48] sm:$0xff]   ;;  %v841_v49 = vld [vmem:[#allocation2] sm:$0xe0] }
 0x19d   : > { %v853_v63 = vmul.f32 %v3105_v44, %v841_v49 }
 0x19f   : > { %v2569_v50 = vpop.eup %2568 }
 0x1a0   : > { %v410_v52 = vmul.f32 %v2569_v50, %v3055_v16  ;;  %v960_v16 = vrot.slane %v777_v3, %v3066_v8  ;;  %v1000_v50 = vmul.f32 %v998_v33, %v988_v37  ;;  %v807_v37 = vld [vmem:[#allocation2 + $0x20] sm:$0x7] }
 0x1a2   : > { %v411_v53 = vpack.c.bf16 %v410_v52, %v409_v51  ;;  %v962_v31 = vmul.f32 0.0, %v960_v16  ;;  %v3116_v51 = vmul.f32 0.0, %v998_v33  ;;  %v3120_v52 = vrot.slane %v3093_v32, %v3074_v17  ;;  %v1130_v16 = vld [vmem:[#allocation2 + $0x18] sm:$0xc0] }
 0x1a4   : > { %659 = vmatmul.mubr.bf16.vlgmr.msra.gmra.mxu0 %v411_v53  ;;  %702 = vmatmul.mubr.bf16.vlgmr.msra.gmra.mxu1 %v411_v53  ;;  %v3110_v47 = vrot.slane %v962_v31, 4  ;;  %v1082_v53 = vld [vmem:[#allocation2 + $0x18] sm:$0xf0] }
 0x1a5   : > { %2368 = vmatpush3.bf16.msra.mxu0 %v2551_v56  ;;  %v817_v56 = vmul.f32 %v3099_v36, %v805_v40  ;;  %v1094_v3 = vmul.f32 %v3114_v48, %v1082_v53  ;;  %v1106_v31 = vld [vmem:[#allocation2 + $0x18] sm:$0xe0] }
 0x1a6   : > { %2369 = vmatprep.subr.bf16.mxu0 %v2552_v57  ;;  %v1034_v57 = vld [vmem:[#allocation2 + $0x18] sm:$0xfc] }
 0x1a7   : > { %v1046_v9 = vmul.f32 %v3120_v52, %v1034_v57  ;;  %v946_v29 = vadd.f32 %v934_v60, %v817_v56 }
 0x1a9   : > { %2370 = vmatpush3.bf16.msra.mxu0 %v2553_v58  ;;  %v875_v58 = vmul.f32 %v869_v7, %v861_v45  ;;  %v1015_v7 = vrot.slane %v3116_v51, 4  ;;  %v1118_v51 = vmul.f32 %v3150_v15, %v1106_v31 }
 0x1aa   : > { %2371 = vmatprep.subr.bf16.mxu0 %v2554_v59  ;;  %v900_v59 = vadd.f32 %v888_v46, %v799_v39 }
 0x1ac   : > { %v3160_v46 = vadd.f32 %v1046_v9, %v900_v59 }
 0x1ad   : > { %2372 = vmatpush3.bf16.msra.mxu0 %v2555_v61  ;;  %v3134_v61 = vrot.slane %v3093_v32, %v3090_v26 }
 0x1ae   : > { %2373 = vmatprep.subr.bf16.mxu0 %v2556_v62  ;;  %v837_v62 = vmul.f32 0.0, %v3084_v23 }
 0x1b1   : > { %2374 = vmatpush3.bf16.msra.mxu0 %v2557_v0  ;;  %v908_v0 = vld [vmem:[#allocation2 + $0x20] sm:$0x7f] }
 0x1b2   : > { %2375 = vmatprep.subr.bf16.mxu0 %v2558_v1  ;;  %v982_v1 = vadd.f32 %v3110_v47, %v835_v41  ;;  %v922_v28 = vmul.f32 %v3069_v11, %v908_v0  ;;  %v1096_v41 = vmul.f32 0.0, %v3114_v48  ;;  %v801_v11 = vmul.f32 0.0, %v3081_v21  ;;  %v843_v0 = vld [vmem:[#allocation2 + $0x20] sm:$0x1f] }
 0x1b3   : > { %v857_v31 = vmul.f32 %v3105_v44, %v843_v0 }
 0x1b4   : > { %v3162_v49 = vadd.f32 %v1094_v3, %v982_v1  ;;  %v1120_v3 = vmul.f32 0.0, %v3150_v15 }
 0x1b5   : > { %2376 = vmatpush3.bf16.msra.mxu0 %v2559_v4  ;;  %v990_v4 = vld [vmem:[#allocation2 + $0x38] sm:$0x1] }
 0x1b6   : > { %2377 = vmatprep.subr.bf16.mxu0 %v2560_v6  ;;  %v1012_v6 = vrot.slane %v1000_v50, 4  ;;  %v1004_v39 = vmul.f32 %v998_v33, %v990_v4  ;;  %v803_v50 = vmul.f32 %v3081_v21, %v789_v22  ;;  %v821_v33 = vmul.f32 %v3099_v36, %v807_v37  ;;  %v1132_v4 = vld [vmem:[#allocation2 + $0x38] sm:$0x3f] }
 0x1b7   : > { %v819_v21 = vmul.f32 0.0, %v3099_v36 }
 0x1b8   : > { %v1016_v42 = vsel %vm882_vm0, %v1012_v6, %v1015_v7  ;;  %v1028_v45 = vadd.f32 %v1012_v6, %v853_v63  ;;  %v1019_v59 = vrot.slane %v1004_v39, 4  ;;  %v1048_v6 = vmul.f32 0.0, %v3120_v52 }
 0x1b9   : > { %2378 = vmatpush3.bf16.msra.mxu0 %v2561_v10  ;;  %v1058_v10 = vld [vmem:[#allocation2 + $0x18] sm:$0xf8]  ;;  %v1030_v1 = vadd.f32 %v1016_v42, %v855_v24  ;;  %v1036_v24 = vld [vmem:[#allocation2 + $0x38] sm:$0x3] }
 0x1ba   : > { %2379 = vmatprep.subr.bf16.mxu0 %v2562_v12  ;;  %v3143_v12 = vrot.slane %v444_v34, %v3090_v26  ;;  %v984_v34 = vadd.f32 %v3110_v47, %v837_v62  ;;  %v1070_v40 = vmul.f32 %v3134_v61, %v1058_v10  ;;  %v3183_v9 = vadd.f32 %v1118_v51, %v1028_v45  ;;  %v1176_v10 = vld [vmem:[#allocation2 + $0x18] sm:$0x80] }
 0x1bb   : > { %v1020_v37 = vsel %vm882_vm0, %v1015_v7, %v1019_v59  ;;  %v1050_v44 = vmul.f32 %v3120_v52, %v1036_v24  ;;  %v1072_v7 = vmul.f32 0.0, %v3134_v61  ;;  %v1203_v59 = vrot.slane %v1190_v25, 4 }
 0x1bc   : > { %v3172_v60 = vadd.f32 %v1070_v40, %v946_v29  ;;  %v3174_v62 = vadd.f32 %v1096_v41, %v984_v34  ;;  %v1178_v40 = vld [vmem:[#allocation2 + $0x38] sm:$0x7f]  ;;  %v1188_v41 = vmul.f32 %v1186_v14, %v1176_v10 }
 0x1bd   : > { %2380 = vmatpush3.bf16.msra.mxu0 %v2563_v20  ;;  %v1140_v20 = vrot.slane %v3093_v32, %v3061_v2 }
 0x1be   : > { %2381 = vmatprep.subr.bf16.mxu0 %v2564_v27  ;;  %v891_v27 = vrot.slane %v875_v58, 4  ;;  %v937_v58 = vrot.slane %v922_v28, 4  ;;  %v1060_v28 = vld [vmem:[#allocation2 + $0x38] sm:$0x7]  ;;  %v1202_v52 = vrot.slane %v1188_v41, 4 }
 0x1bf   : > { %v1142_v53 = vmul.f32 %v1140_v20, %v1130_v16  ;;  %v3176_v63 = vmul.f32 0.0, %v1140_v20  ;;  %v1146_v34 = vmul.f32 %v1140_v20, %v1132_v4  ;;  %v1258_v20 = vld [vmem:[#allocation2 + $0x20] sm:$0xfe] }
 0x1c0   : > { %v892_v57 = vsel %vm882_vm0, %v887_v30, %v891_v27  ;;  %v904_v30 = vadd.f32 %v891_v27, %v803_v50  ;;  %v938_v16 = vsel %vm882_vm0, %v933_v43, %v937_v58  ;;  %v950_v36 = vadd.f32 %v937_v58, %v821_v33  ;;  %v1084_v27 = vld [vmem:[#allocation2 + $0x38] sm:$0xf] }
 0x1c1   : > { %2382 = vmatpush3.bf16.msra.mxu0 %v2565_v38  ;;  %v825_v38 = vld [vmem:[#allocation2 + $0x20] sm:$0xf]  ;;  %v1156_v29 = vrot.slane %v1142_v53, 4  ;;  %v1157_v39 = vrot.slane %v3176_v63, 4  ;;  %v1230_v43 = vrot.slane %v3093_v32, %v3066_v8  ;;  %v948_v42 = vadd.f32 %v938_v16, %v819_v21 }
 0x1c2   : > { %v839_v56 = vmul.f32 %v3084_v23, %v825_v38  ;;  %v902_v23 = vadd.f32 %v892_v57, %v801_v11  ;;  %v1108_v38 = vld [vmem:[#allocation2 + $0x38] sm:$0x1f]  ;;  %v781_v11 = vld [vmem:[#allocation10 + $0x28] sm:$0xff]  ;;  %v1074_v50 = vmul.f32 %v3134_v61, %v1060_v28  ;;  %v1098_v51 = vmul.f32 %v3114_v48, %v1084_v27 }
 0x1c3   : > { %v1122_v53 = vmul.f32 %v3150_v15, %v1108_v38  ;;  %v3205_v33 = vadd.f32 %v1120_v3, %v1030_v1  ;;  %v1161_v57 = vrot.slane %v1146_v34, 4  ;;  %v3208_v58 = vmul.f32 %v1186_v14, %v1178_v40  ;;  %v1400_v14 = vld [vmem:[#allocation2 + $0x20] sm:$0xc0] }
 0x1c4   : > { %v986_v22 = vadd.f32 %v3110_v47, %v839_v56  ;;  %v3196_v47 = vrot.slane %v3093_v32, %v3078_v19  ;;  %v3199_v45 = vadd.f32 %v1048_v6, %v902_v23  ;;  %v1032_v56 = vadd.f32 %v1020_v37, %v857_v31  ;;  %v1304_v31 = vld [vmem:[#allocation2 + $0x20] sm:$0xfc] }
 0x1c5   : > { %v1158_v32 = vsel %vm882_vm0, %v1156_v29, %v1157_v39  ;;  %v1232_v63 = vmul.f32 0.0, %v1230_v43  ;;  %v1056_v0 = vadd.f32 %v1050_v44, %v904_v30  ;;  %v1078_v4 = vadd.f32 %v1072_v7, %v948_v42  ;;  %v1328_v37 = vld [vmem:[#allocation2 + $0x20] sm:$0xf8] }
 0x1c6   : > { %3963 = vst [vmem:[#allocation19_spill] sm:$0xff] %v3196_v47  ;;  %v1270_v21 = vmul.f32 %v3196_v47, %v1258_v20  ;;  %v3212_v61 = vrot.slane %v781_v11, %v3074_v17  ;;  %v3215_v48 = vrot.slane %v781_v11, %v3061_v2  ;;  %v3217_v15 = vadd.f32 %v1074_v50, %v950_v36  ;;  %v1446_v36 = vld [vmem:[#allocation2 + $0x20] sm:$0x80] }
 0x1c7   : > { %v1170_v1 = vadd.f32 %v1158_v32, %v3160_v46  ;;  %v3221_v3 = vrot.slane %v781_v11, %v3090_v26  ;;  %v3224_v23 = vrot.slane %v781_v11, %v3063_v5  ;;  %v3226_v6 = vadd.f32 %v1098_v51, %v986_v22  ;;  %v1352_v40 = vld [vmem:[#allocation2 + $0x20] sm:$0xf0]  ;;  %v1528_v51 = vld [vmem:[#allocation2 + $0x38] sm:$0xfe] }
 0x1c8   : > { %3964 = vst [vmem:[#allocation20_spill] sm:$0xff] %v3212_v61  ;;  %3965 = vst [vmem:[#allocation21_spill] sm:$0xff] %v3215_v48  ;;  %v3228_v30 = vadd.f32 %v1122_v53, %v1032_v56  ;;  %v3891_v10 = vrot.slane %v3208_v58, 4  ;;  %v3232_v16 = vmul.f32 0.0, %v3196_v47  ;;  %v1162_v24 = vsel %vm882_vm0, %v1157_v39, %v1161_v57  ;;  %v1376_v39 = vld [vmem:[#allocation2 + $0x20] sm:$0xe0] }
 0x1c9   : > { %3966 = vst [vmem:[#allocation22_spill] sm:$0xff] %v3221_v3  ;;  %3967 = vst [vmem:[#allocation23_spill] sm:$0xff] %v3224_v23  ;;  %v1204_v46 = vsel %vm882_vm0, %v1202_v52, %v1203_v59  ;;  %v3236_v28 = vrot.slane %v1232_v63, 4  ;;  %v1282_v29 = vrot.slane %v1270_v21, 4  ;;  %v3239_v22 = vrot.slane %v781_v11, %v3076_v18 }
 0x1ca   : > { %3968 = vst [vmem:[#allocation24_spill] sm:$0xff] %v3228_v30  ;;  %3969 = vst [vmem:[#allocation25_spill] sm:$0xff] %v3232_v16  ;;  %v3242_v27 = vrot.slane %v781_v11, %v3096_v35  ;;  %v1412_v38 = vmul.f32 %v3215_v48, %v1400_v14  ;;  %v3246_v34 = vmul.f32 0.0, %v3215_v48  ;;  %v1458_v41 = vmul.f32 %v3224_v23, %v1446_v36 }
 0x1cb   : > { %3970 = vst [vmem:[#allocation26_spill] sm:$0xff] %v3239_v22  ;;  %v3250_v25 = vmul.f32 0.0, %v3224_v23  ;;  %v3253_v43 = vrot.slane %v781_v11, %v3066_v8  ;;  %v3256_v42 = vrot.slane %v781_v11, %v3078_v19  ;;  %v3258_v44 = vadd.f32 %v1161_v57, %v1056_v0  ;;  %v783_v57 = vld [vmem:[#allocation10 + $0x38] sm:$0xff] }
 0x1cc   : > { %3971 = vst [vmem:[#allocation27_spill] sm:$0xff] %v3242_v27  ;;  %3972 = vst [vmem:[#allocation28_spill] sm:$0xff] %v3246_v34  ;;  %v1208_v7 = vsel %vm882_vm0, %v1203_v59, %v3891_v10  ;;  %v1216_v20 = vadd.f32 %v1204_v46, %v3172_v60  ;;  %v3890_v50 = vrot.slane %v3232_v16, 4  ;;  %v1252_v53 = vadd.f32 %v3236_v28, %v3162_v49 }
 0x1cd   : > { %3973 = vst [vmem:[#allocation29_spill] sm:$0xff] %v3250_v25  ;;  %3974 = vst [vmem:[#allocation30_spill] sm:$0xff] %v3258_v44  ;;  %v1298_v56 = vadd.f32 %v1282_v29, %v3183_v9  ;;  %v1316_v32 = vmul.f32 %v3212_v61, %v1304_v31  ;;  %v1340_v11 = vmul.f32 %v3221_v3, %v1328_v37  ;;  %v1426_v59 = vrot.slane %v1412_v38, 4 }
 0x1ce   : > { %v1364_v52 = vmul.f32 %v3239_v22, %v1352_v40  ;;  %v1388_v63 = vmul.f32 %v3242_v27, %v1376_v39  ;;  %v3888_v60 = vrot.slane %v3246_v34, 4  ;;  %v1472_v21 = vrot.slane %v1458_v41, 4 }
 0x1cf   : > { %v3889_v0 = vrot.slane %v3250_v25, 4  ;;  %v3275_v14 = vmul.f32 0.0, %v3253_v43  ;;  %v3278_v49 = vmul.f32 %v3256_v42, %v1528_v51  ;;  %v1172_v9 = vadd.f32 %v1162_v24, %v3199_v45  ;;  %v1576_v51 = vld [vmem:[#allocation2 + $0x38] sm:$0xfc] }
 0x1d0   : > { %v1218_v36 = vadd.f32 %v1208_v7, %v1078_v4  ;;  %v1318_v46 = vmul.f32 0.0, %v3212_v61  ;;  %v1286_v31 = vsel %vm882_vm0, %v1282_v29, %v3890_v50  ;;  %v1322_v37 = vadd.f32 %v1316_v32, %v1170_v1  ;;  %v776_v50 = vld [vmem:[#allocation10] sm:$0xff] }
 0x1d1   : > { %3975 = vst [vmem:[#allocation31_spill] sm:$0xff] %v3275_v14  ;;  %3976 = vst [vmem:[#allocation32_spill] sm:$0xff] %v3278_v49  ;;  %v1346_v38 = vadd.f32 %v1340_v11, %v1216_v20  ;;  %v3286_v40 = vrot.slane %v783_v57, %v3074_v17  ;;  %v1370_v39 = vadd.f32 %v1364_v52, %v1252_v53  ;;  %v3894_v29 = vrot.slane %v3275_v14, 4  ;;  %v1600_v20 = vld [vmem:[#allocation2 + $0x38] sm:$0xf8]  ;;  %v780_v14 = vld [vmem:[#allocation10 + $0x20] sm:$0xff] }
 0x1d2   : > { %v1428_v41 = vsel %vm882_vm0, %v1426_v59, %v3888_v60  ;;  %v3292_v45 = vrot.slane %v783_v57, %v3090_v26  ;;  %v3295_v4 = vrot.slane %v783_v57, %v3076_v18  ;;  %v1394_v24 = vadd.f32 %v1388_v63, %v1298_v56  ;;  %v1624_v53 = vld [vmem:[#allocation2 + $0x38] sm:$0xf0] }
 0x1d3   : > { %3977 = vst [vmem:[#allocation33_spill] sm:$0xff] %v3286_v40  ;;  %v1474_v1 = vsel %vm882_vm0, %v1472_v21, %v3889_v0  ;;  %v1254_v32 = vadd.f32 %v3236_v28, %v3174_v62  ;;  %v1300_v11 = vadd.f32 %v1286_v31, %v3205_v33  ;;  %v1342_v52 = vmul.f32 0.0, %v3221_v3  ;;  %v1648_v56 = vld [vmem:[#allocation2 + $0x38] sm:$0xe0] }
 0x1d4   : > { %3978 = vst [vmem:[#allocation34_spill] sm:$0xff] %v3292_v45  ;;  %3979 = vst [vmem:[#allocation35_spill] sm:$0xff] %v3295_v4  ;;  %v1366_v59 = vmul.f32 0.0, %v3239_v22  ;;  %v1390_v63 = vmul.f32 0.0, %v3242_v27  ;;  %v1440_v60 = vadd.f32 %v1428_v41, %v1322_v37  ;;  %v1588_v21 = vmul.f32 %v3286_v40, %v1576_v51  ;;  %v1672_v51 = vld [vmem:[#allocation2 + $0x38] sm:$0xc0] }
 0x1d5   : > { %v3310_v0 = vrot.slane %v783_v57, %v3096_v35  ;;  %v1486_v10 = vadd.f32 %v1474_v1, %v1346_v38  ;;  %v1612_v7 = vmul.f32 %v3292_v45, %v1600_v20  ;;  %v1636_v62 = vmul.f32 %v3295_v4, %v1624_v53  ;;  %v858_v27 = vld [vmem:[#allocation2 + $0x30] sm:$0xc0] }
 0x1d6   : > { %v3315_v33 = vrot.slane %v783_v57, %v3061_v2  ;;  %v1522_v31 = vadd.f32 %v3894_v29, %v1370_v39  ;;  %v3981_v25 = vrot.slane %v3278_v49, 4  ;;  %v3323_v34 = vrot.slane %v783_v57, %v3063_v5  ;;  %v1718_v39 = vld [vmem:[#allocation2 + $0x38] sm:$0x80] }
 0x1d7   : > { %3980 = vst [vmem:[#allocation36_spill] sm:$0xff] %v3310_v0  ;;  %v1660_v41 = vmul.f32 %v3310_v0, %v1648_v56  ;;  %v3982_v38 = vrot.slane %v3208_v58, 4  ;;  %v3332_v20 = vadd.f32 %v3236_v28, %v3226_v6  ;;  %v3334_v53 = vadd.f32 %v1318_v46, %v1172_v9  ;;  %v860_v9 = vld [vmem:[#allocation2 + $0x50] sm:$0x3f] }
 0x1d8   : > { %v1570_v37 = vadd.f32 %v3981_v25, %v1394_v24  ;;  %v865_v25 = vrot.slane %v776_v50, %v3061_v2  ;;  %v3337_v24 = vadd.f32 %v1342_v52, %v1218_v36  ;;  %v3339_v56 = vadd.f32 %v1366_v59, %v1254_v32  ;;  %v905_v36 = vld [vmem:[#allocation2 + $0x30] sm:$0x80]  ;;  %v907_v46 = vld [vmem:[#allocation2 + $0x50] sm:$0x7f] }
 0x1d9   : > { %v3328_v1 = vadd.f32 %v3982_v38, %v3217_v15  ;;  %3984 = vst [vmem:[#allocation38_spill] sm:$0xff] %v3332_v20  ;;  %3985 = vst [vmem:[#allocation39_spill] sm:$0xff] %v3334_v53  ;;  %v3341_v29 = vadd.f32 %v1390_v63, %v1300_v11  ;;  %v912_v58 = vrot.slane %v776_v50, %v3063_v5  ;;  %v824_v20 = vld [vmem:[#allocation2 + $0x50] sm:$0xf] }
 0x1da   : > { %3986 = vst [vmem:[#allocation40_spill] sm:$0xff] %v3337_v24  ;;  %3987 = vst [vmem:[#allocation41_spill] sm:$0xff] %v3339_v56  ;;  %v3344_v15 = vadd.f32 %v1588_v21, %v1440_v60  ;;  %v3346_v38 = vadd.f32 %v1612_v7, %v1486_v10  ;;  %v3349_v6 = vmul.f32 %v3315_v33, %v1672_v51  ;;  %v3364_v10 = vld [vmem:[%s3880_s4] sm:$0x3]  ;;  %v784_v7 = vld [vmem:[#allocation2 + $0x30] sm:$0xfc] }
 0x1db   : > { %3983 = vst [vmem:[#allocation37_spill] sm:$0xff] %v3328_v1  ;;  %3988 = vst [vmem:[#allocation42_spill] sm:$0xff] %v3341_v29  ;;  %v3352_v28 = vrot.slane %v783_v57, %v3066_v8  ;;  %v3354_v32 = vadd.f32 %v1636_v62, %v1522_v31  ;;  %v3356_v11 = vadd.f32 %v1660_v41, %v1570_v37  ;;  %v872_v63 = vmul.f32 0.0, %v865_v25 }
 0x1dc   : > { %3989 = vst [vmem:[#allocation43_spill] sm:$0xff] %v3344_v15  ;;  %3990 = vst [vmem:[#allocation44_spill] sm:$0xff] %v3346_v38  ;;  %v3359_v52 = vmul.f32 %v3323_v34, %v1718_v39  ;;  %v793_v60 = vrot.slane %v776_v50, %v3074_v17  ;;  %v3369_v57 = vrot.slane %v3364_v10, %v3090_v26  ;;  %v919_v37 = vmul.f32 0.0, %v912_v58  ;;  %v788_v39 = vld [vmem:[#allocation2 + $0x50] sm:$0x3] }
 0x1dd   : > { %3991 = vst [vmem:[#allocation45_spill] sm:$0xff] %v3349_v6  ;;  %3992 = vst [vmem:[#allocation46_spill] sm:$0xff] %v3354_v32  ;;  %v870_v59 = vmul.f32 %v865_v25, %v858_v27  ;;  %v956_v21 = vrot.slane %v776_v50, %v3066_v8  ;;  %v874_v62 = vmul.f32 %v865_v25, %v860_v9  ;;  %v804_v25 = vld [vmem:[#allocation2 + $0x30] sm:$0xf8]  ;;  %v806_v9 = vld [vmem:[#allocation2 + $0x50] sm:$0x7] }
 0x1de   : > { %3993 = vst [vmem:[#allocation47_spill] sm:$0xff] %v3356_v11  ;;  %3994 = vst [vmem:[#allocation48_spill] sm:$0xff] %v3359_v52  ;;  %v917_v31 = vmul.f32 %v912_v58, %v905_v36  ;;  %v921_v41 = vmul.f32 %v912_v58, %v907_v46  ;;  %v811_v53 = vrot.slane %v776_v50, %v3090_v26  ;;  %v800_v36 = vmul.f32 0.0, %v793_v60  ;;  %v822_v46 = vld [vmem:[#allocation2 + $0x30] sm:$0xf0] }
 0x1df   : > { %3995 = vst [vmem:[#allocation49_spill] sm:$0xff] %v3364_v10  ;;  %3996 = vst [vmem:[#allocation50_spill] sm:$0xff] %v3369_v57  ;;  %v829_v24 = vrot.slane %v776_v50, %v3076_v18  ;;  %v847_v30 = vrot.slane %v776_v50, %v3096_v35  ;;  %v3378_v57 = vld [vmem:[#allocation10 + $0x10] sm:$0xff]  ;;  %v798_v44 = vmul.f32 %v793_v60, %v784_v7  ;;  %v883_v51 = vrot.slane %v870_v59, 4  ;;  %v989_v7 = vld [vmem:[#allocation2 + $0x8] sm:$0x1] }
 0x1e0   : > { %v994_v58 = vrot.slane %v776_v50, %v3078_v19  ;;  %v884_v16 = vrot.slane %v872_v63, 4  ;;  %v961_v32 = vmul.f32 0.0, %v956_v21  ;;  %v987_v38 = vld [vmem:[#allocation2 + $0x58] sm:$0xfe]  ;;  %v889_v23 = vrot.slane %v874_v62, 4 }
 0x1e1   : > { %v929_v1 = vrot.slane %v917_v31, 4  ;;  %v930_v48 = vrot.slane %v919_v37, 4  ;;  %v935_v10 = vrot.slane %v921_v41, 4  ;;  %v802_v22 = vmul.f32 %v793_v60, %v788_v39  ;;  %v840_v52 = vld [vmem:[#allocation2 + $0x30] sm:$0xe0] }
 0x1e2   : > { %v816_v27 = vmul.f32 %v811_v53, %v804_v25  ;;  %v818_v11 = vmul.f32 0.0, %v811_v53  ;;  %v820_v3 = vmul.f32 %v811_v53, %v806_v9  ;;  %v834_v61 = vmul.f32 %v829_v24, %v822_v46  ;;  %v842_v50 = vld [vmem:[#allocation2 + $0x50] sm:$0x1f]  ;;  %v1033_v9 = vld [vmem:[#allocation2 + $0x58] sm:$0xfc] }
 0x1e3   : > { %v836_v47 = vmul.f32 0.0, %v829_v24  ;;  %v999_v15 = vmul.f32 %v994_v58, %v987_v38  ;;  %v1001_v0 = vmul.f32 0.0, %v994_v58  ;;  %v838_v59 = vmul.f32 %v829_v24, %v824_v20 }
 0x1e4   : > { %v885_v63 = vsel %vm882_vm0, %v883_v51, %v884_v16  ;;  %v969_v21 = vrot.slane %v961_v32, 4  ;;  %v1040_v62 = vrot.slane %v3378_v57, %v3074_v17  ;;  %v890_v31 = vsel %vm882_vm0, %v884_v16, %v889_v23 }
 0x1e5   : > { %v931_v60 = vsel %vm882_vm0, %v929_v1, %v930_v48  ;;  %v936_v53 = vsel %vm882_vm0, %v930_v48, %v935_v10  ;;  %v1003_v37 = vmul.f32 %v994_v58, %v989_v7  ;;  %v852_v41 = vmul.f32 %v847_v30, %v840_v52  ;;  %v1035_v1 = vld [vmem:[#allocation2 + $0x8] sm:$0x3] }
 0x1e6   : > { %v854_v39 = vmul.f32 0.0, %v847_v30  ;;  %v856_v25 = vmul.f32 %v847_v30, %v842_v50  ;;  %v3389_v20 = vrot.slane %v3378_v57, %v3090_v26  ;;  %v903_v24 = vadd.f32 %v889_v23, %v802_v22  ;;  %v1057_v50 = vld [vmem:[#allocation2 + $0x58] sm:$0xf8] }
 0x1e7   : > { %v1011_v38 = vrot.slane %v999_v15, 4  ;;  %v1013_v32 = vrot.slane %v1001_v0, 4  ;;  %v899_v51 = vadd.f32 %v885_v63, %v798_v44  ;;  %v901_v46 = vadd.f32 %v890_v31, %v800_v36 }
 0x1e8   : > { %v3391_v4 = vadd.f32 %v931_v60, %v816_v27  ;;  %v3393_v16 = vadd.f32 %v936_v53, %v818_v11  ;;  %v3395_v58 = vadd.f32 %v935_v10, %v820_v3  ;;  %v1017_v52 = vrot.slane %v1003_v37, 4  ;;  %v1131_v60 = vld [vmem:[#allocation2 + $0x8] sm:$0x3f] }
 0x1e9   : > { %v1045_v30 = vmul.f32 %v1040_v62, %v1033_v9  ;;  %v1047_v7 = vmul.f32 0.0, %v1040_v62  ;;  %v3398_v40 = vadd.f32 %v969_v21, %v834_v61  ;;  %v3400_v23 = vadd.f32 %v969_v21, %v836_v47  ;;  %v1129_v47 = vld [vmem:[#allocation2 + $0x58] sm:$0xc0] }
 0x1ea   : > { %v3402_v22 = vadd.f32 %v969_v21, %v838_v59  ;;  %v1014_v0 = vsel %vm882_vm0, %v1011_v38, %v1013_v32  ;;  %v3405_v15 = vadd.f32 %v1011_v38, %v852_v41  ;;  %v1049_v11 = vmul.f32 %v1040_v62, %v1035_v1  ;;  %v1175_v41 = vld [vmem:[#allocation2 + $0x58] sm:$0x80] }
 0x1eb   : > { %v1136_v3 = vrot.slane %v3378_v57, %v3061_v2  ;;  %v1069_v36 = vmul.f32 %v3389_v20, %v1057_v50  ;;  %v1071_v61 = vmul.f32 0.0, %v3389_v20  ;;  %v1018_v59 = vsel %vm882_vm0, %v1013_v32, %v1017_v52 }
 0x1ec   : > { %v3413_v21 = vadd.f32 %v1045_v30, %v899_v51  ;;  %v3415_v31 = vadd.f32 %v1047_v7, %v901_v46  ;;  %v1182_v62 = vrot.slane %v3378_v57, %v3063_v5  ;;  %v1029_v37 = vadd.f32 %v1014_v0, %v854_v39  ;;  %v1177_v51 = vld [vmem:[#allocation2 + $0x8] sm:$0x7f]  ;;  %v1081_v7 = vld [vmem:[#allocation2 + $0x58] sm:$0xf0] }
 0x1ed   : > { %v1088_v38 = vrot.slane %v3378_v57, %v3076_v18  ;;  %v1141_v1 = vmul.f32 %v1136_v3, %v1129_v47  ;;  %v1143_v32 = vmul.f32 0.0, %v1136_v3  ;;  %v1226_v46 = vrot.slane %v3378_v57, %v3066_v8  ;;  %v1059_v30 = vld [vmem:[#allocation2 + $0x8] sm:$0x7]  ;;  %v1105_v47 = vld [vmem:[#allocation2 + $0x58] sm:$0xe0] }
 0x1ee   : > { %v1145_v50 = vmul.f32 %v1136_v3, %v1131_v60  ;;  %v1055_v39 = vadd.f32 %v1049_v11, %v903_v24  ;;  %v1112_v0 = vrot.slane %v3378_v57, %v3096_v35  ;;  %v1189_v6 = vmul.f32 0.0, %v1182_v62 }
 0x1ef   : > { %v1191_v29 = vmul.f32 %v1182_v62, %v1177_v51  ;;  %v1154_v3 = vrot.slane %v1143_v32, 4  ;;  %v1231_v24 = vmul.f32 0.0, %v1226_v46 }
 0x1f0   : > { %v1119_v60 = vmul.f32 0.0, %v1112_v0 }
 0x1f1   : > { %v1205_v49 = vrot.slane %v1191_v29, 4  ;;  %v1239_v46 = vrot.slane %v1231_v24, 4 }
 0x264   : > { %v703_v48 = vpop.f32.mrf.mxu1 }
 0x265   : > { %v704_v45 = vadd.f32 %v703_v48, %v3126_v55 }
 0x266   : > { %v705_v44 = vpop.f32.mrf.mxu1 }
 0x267   : > { %v2333_v10 = vmul.f32 -1.442695, %v704_v45  ;;  %v706_v27 = vadd.f32 %v705_v44, %v3146_v13  ;;  %v1083_v44 = vld [vmem:[#allocation2 + $0x8] sm:$0xf] }
 0x268   : > { %v707_v63 = vpop.f32.mrf.mxu1  ;;  %v1097_v11 = vmul.f32 %v1088_v38, %v1083_v44  ;;  %v1399_v44 = vld [vmem:[#allocation2 + $0x50] sm:$0xc0] }
 0x269   : > { %2570 = vpow2.f32 %v2333_v10  ;;  %v2334_v45 = vmul.f32 -1.442695, %v706_v27  ;;  %v708_v53 = vadd.f32 %v707_v63, %v3126_v55  ;;  %v1031_v55 = vadd.f32 %v1018_v59, %v856_v25  ;;  %v1107_v63 = vld [vmem:[#allocation2 + $0x8] sm:$0x1f] }
 0x26a   : > { %v709_v9 = vpop.f32.mrf.mxu1  ;;  %v1187_v10 = vmul.f32 %v1182_v62, %v1175_v41  ;;  %v1159_v25 = vrot.slane %v1145_v50, 4  ;;  %v1117_v59 = vmul.f32 %v1112_v0, %v1105_v47  ;;  %v1121_v56 = vmul.f32 %v1112_v0, %v1107_v63  ;;  %v1303_v47 = vld [vmem:[#allocation2 + $0x50] sm:$0xfc] }
 0x26b   : > { %2572 = vpow2.f32 %v2334_v45  ;;  %v2335_v48 = vmul.f32 -1.442695, %v708_v53  ;;  %v710_v52 = vadd.f32 %v709_v9, %v3146_v13  ;;  %v1073_v45 = vmul.f32 %v3389_v20, %v1059_v30 }
 0x26c   : > { %v1093_v53 = vmul.f32 %v1088_v38, %v1081_v7  ;;  %v1095_v13 = vmul.f32 0.0, %v1088_v38  ;;  %v1153_v9 = vrot.slane %v1141_v1, 4  ;;  %v1075_v41 = vadd.f32 %v1069_v36, %v3391_v4 }
 0x26d   : > { %2574 = vpow2.f32 %v2335_v48  ;;  %v2336_v27 = vmul.f32 -1.442695, %v710_v52  ;;  %v1199_v48 = vrot.slane %v1187_v10, 4  ;;  %v1200_v52 = vrot.slane %v1189_v6, 4 }
 0x26e   : > { %v1077_v62 = vadd.f32 %v1071_v61, %v3393_v16  ;;  %v1079_v20 = vadd.f32 %v1073_v45, %v3395_v58  ;;  %v1099_v1 = vadd.f32 %v1093_v53, %v3398_v40  ;;  %v1101_v32 = vadd.f32 %v1095_v13, %v3400_v23  ;;  %v1257_v40 = vld [vmem:[#allocation2 + $0x50] sm:$0xfe] }
 0x26f   : > { %2576 = vpow2.f32 %v2336_v27  ;;  %v1155_v51 = vsel %vm882_vm0, %v1153_v9, %v1154_v3  ;;  %v1160_v38 = vsel %vm882_vm0, %v1154_v3, %v1159_v25  ;;  %v3437_v4 = vrot.slane %v3378_v57, %v3078_v19  ;;  %v1445_v3 = vld [vmem:[#allocation2 + $0x50] sm:$0x80] }
 0x270   : > { %v1103_v29 = vadd.f32 %v1097_v11, %v3402_v22  ;;  %v1123_v6 = vadd.f32 %v1117_v59, %v3405_v15  ;;  %v3441_v16 = vadd.f32 %v1119_v60, %v1029_v37  ;;  %v3443_v58 = vadd.f32 %v1121_v56, %v1031_v55  ;;  %v1351_v60 = vld [vmem:[#allocation2 + $0x50] sm:$0xf0] }
 0x271   : > { %v1201_v23 = vsel %vm882_vm0, %v1199_v48, %v1200_v52  ;;  %v1206_v36 = vsel %vm882_vm0, %v1200_v52, %v1205_v49  ;;  %v3448_v61 = vrot.slane %v780_v14, %v3074_v17  ;;  %v1169_v57 = vadd.f32 %v1155_v51, %v3413_v21  ;;  %v660_v48 = vpop.f32.mrf.mxu0 }
 0x272   : > { %v3452_v7 = vadd.f32 %v1160_v38, %v3415_v31  ;;  %v3454_v22 = vadd.f32 %v1159_v25, %v1055_v39  ;;  %v3457_v15 = vrot.slane %v780_v14, %v3061_v2  ;;  %v3459_v37 = vadd.f32 %v1205_v49, %v1079_v20  ;;  %v1327_v20 = vld [vmem:[#allocation2 + $0x50] sm:$0xf8] }
 0x273   : > { %v1269_v50 = vmul.f32 %v3437_v4, %v1257_v40  ;;  %v3463_v55 = vmul.f32 0.0, %v3437_v4  ;;  %v1215_v10 = vadd.f32 %v1201_v23, %v1075_v41  ;;  %v3465_v21 = vadd.f32 %v1206_v36, %v1077_v62  ;;  %v3495_v38 = vld [vmem:[#allocation10 + $0x30] sm:$0xff] }
 0x274   : > { %v1251_v31 = vadd.f32 %v1239_v46, %v1099_v1  ;;  %v3467_v27 = vadd.f32 %v1239_v46, %v1101_v32  ;;  %v3470_v63 = vrot.slane %v780_v14, %v3090_v26  ;;  %v3473_v49 = vrot.slane %v780_v14, %v3063_v5  ;;  %v1375_v40 = vld [vmem:[#allocation2 + $0x50] sm:$0xe0] }
 0x275   : > { %v3476_v53 = vrot.slane %v780_v14, %v3076_v18  ;;  %v1411_v13 = vmul.f32 %v3457_v15, %v1399_v44  ;;  %v3480_v9 = vmul.f32 0.0, %v3457_v15  ;;  %v3483_v25 = vrot.slane %v780_v14, %v3066_v8 }
 0x276   : > { %v2571_v30 = vpop.eup %2570  ;;  %v1281_v11 = vrot.slane %v1269_v50, 4  ;;  %v3918_v59 = vrot.slane %v3463_v55, 4  ;;  %v3486_v52 = vadd.f32 %v1239_v46, %v1103_v29  ;;  %v1315_v62 = vmul.f32 %v3448_v61, %v1303_v47  ;;  %v1527_v46 = vld [vmem:[#allocation2 + $0x8] sm:$0xfe] }
 0x277   : > { %v724_v56 = vadd.f32 1.0, %v2571_v30  ;;  %v3490_v1 = vrot.slane %v780_v14, %v3096_v35  ;;  %v3493_v32 = vrot.slane %v780_v14, %v3078_v19  ;;  %v1457_v23 = vmul.f32 %v3473_v49, %v1445_v3 }
 0x278   : > { %v2573_v0 = vpop.eup %2572  ;;  %v3499_v36 = vmul.f32 0.0, %v3473_v49  ;;  %v1363_v29 = vmul.f32 %v3476_v53, %v1351_v60  ;;  %v1423_v30 = vrot.slane %v1411_v13, 4  ;;  %v3504_v50 = vmul.f32 0.0, %v3483_v25 }
 0x279   : > { %2578 = vrcp.f32 %v724_v56  ;;  %v725_v39 = vadd.f32 1.0, %v2573_v0  ;;  %3997 = vst [vmem:[#allocation51_spill] sm:$0xff] %v3493_v32  ;;  %v3922_v56 = vrot.slane %v3480_v9, 4  ;;  %v1284_v19 = vsel %vm882_vm0, %v1281_v11, %v3918_v59  ;;  %v662_v0 = vpop.f32.mrf.mxu0 }
 0x27a   : > { %v2575_v45 = vpop.eup %2574  ;;  %v1317_v14 = vmul.f32 0.0, %v3448_v61  ;;  %v1339_v44 = vmul.f32 %v3470_v63, %v1327_v20  ;;  %v1387_v47 = vmul.f32 %v3490_v1, %v1375_v40  ;;  %v3517_v13 = vrot.slane %v3495_v38, %v3074_v17 }
 0x27b   : > { %2580 = vrcp.f32 %v725_v39  ;;  %v726_v24 = vadd.f32 1.0, %v2575_v45  ;;  %v1297_v39 = vadd.f32 %v1281_v11, %v1123_v6  ;;  %v3513_v45 = vmul.f32 %v3493_v32, %v1527_v46  ;;  %v1623_v46 = vld [vmem:[#allocation2 + $0x8] sm:$0xf0] }
 0x27c   : > { %v2577_v41 = vpop.eup %2576  ;;  %3999 = vst [vmem:[#allocation53_spill] sm:$0xff] %v3517_v13  ;;  %v1321_v3 = vadd.f32 %v1315_v62, %v1169_v57  ;;  %v1341_v6 = vmul.f32 0.0, %v3470_v63  ;;  %v1369_v11 = vadd.f32 %v1363_v29, %v1251_v31  ;;  %v1425_v20 = vsel %vm882_vm0, %v1423_v30, %v3922_v56 }
 0x27d   : > { %2582 = vrcp.f32 %v726_v24  ;;  %v727_v51 = vadd.f32 1.0, %v2577_v41  ;;  %3998 = vst [vmem:[#allocation52_spill] sm:$0xff] %v3513_v45  ;;  %v1469_v24 = vrot.slane %v1457_v23, 4  ;;  %v1575_v41 = vld [vmem:[#allocation2 + $0x8] sm:$0xfc]  ;;  %v3923_v40 = vrot.slane %v3504_v50, 4 }
 0x27e   : > { %v1299_v57 = vadd.f32 %v1284_v19, %v3441_v16  ;;  %v1345_v62 = vadd.f32 %v1339_v44, %v1215_v10  ;;  %v2610_v23 = vld [vmem:[#allocation2] sm:$0xff]  ;;  %v1393_v17 = vadd.f32 %v1387_v47, %v1297_v39  ;;  %v1587_v31 = vmul.f32 %v3517_v13, %v1575_v41  ;;  %v1599_v19 = vld [vmem:[#allocation2 + $0x8] sm:$0xf8]  ;;  %v4046_v13 = vld [vmem:[#allocation24_spill] sm:$0xff] }
 0x27f   : > { %2584 = vrcp.f32 %v727_v51  ;;  %v3522_v51 = vrot.slane %v3495_v38, %v3076_v18  ;;  %v1365_v59 = vmul.f32 %v2610_v23, %v3476_v53  ;;  %v1389_v60 = vmul.f32 %v2610_v23, %v3490_v1  ;;  %v664_v18 = vpop.f32.mrf.mxu0  ;;  %v1647_v23 = vld [vmem:[#allocation2 + $0x8] sm:$0xe0] }
 0x280   : > { %v3536_v29 = vrot.slane %v3495_v38, %v3090_v26  ;;  %v661_v30 = vadd.f32 %v660_v48, %v3123_v54  ;;  %v1439_v56 = vadd.f32 %v1425_v20, %v1321_v3  ;;  %v4002_v16 = vrot.slane %v3499_v36, 4 }
 0x281   : > { %4000 = vst [vmem:[#allocation54_spill] sm:$0xff] %v3522_v51  ;;  %v1635_v44 = vmul.f32 %v3522_v51, %v1623_v46  ;;  %v1521_v47 = vadd.f32 %v3923_v40, %v1369_v11  ;;  %v3547_v41 = vrot.slane %v3495_v38, %v3096_v35  ;;  %v3551_v26 = vrot.slane %v3495_v38, %v3061_v2  ;;  %v1671_v46 = vld [vmem:[#allocation2 + $0x8] sm:$0xc0]  ;;  %v666_v40 = vpop.f32.mrf.mxu0 }
 0x282   : > { %4001 = vst [vmem:[#allocation55_spill] sm:$0xff] %v3536_v29  ;;  %v1471_v10 = vsel %vm882_vm0, %v1469_v24, %v4002_v16  ;;  %v3555_v48 = vrot.slane %v3495_v38, %v3063_v5  ;;  %v663_v24 = vadd.f32 %v662_v0, %v3143_v12  ;;  %v3559_v20 = vadd.f32 %v1317_v14, %v3452_v7  ;;  %v1717_v35 = vld [vmem:[#allocation2 + $0x8] sm:$0x80] }
 0x283   : > { %4003 = vst [vmem:[#allocation56_spill] sm:$0xff] %v3547_v41  ;;  %4004 = vst [vmem:[#allocation57_spill] sm:$0xff] %v3551_v26  ;;  %v3562_v11 = vadd.f32 %v1341_v6, %v3465_v21  ;;  %v1485_v32 = vadd.f32 %v1471_v10, %v1345_v62  ;;  %v4007_v2 = vrot.slane %v3513_v45, 4  ;;  %v1611_v5 = vmul.f32 %v3536_v29, %v1599_v19 }
 0x284   : > { %4005 = vst [vmem:[#allocation58_spill] sm:$0xff] %v3555_v48  ;;  %v665_v7 = vadd.f32 %v664_v18, %v3123_v54  ;;  %v3570_v14 = vadd.f32 %v1365_v59, %v3467_v27  ;;  %v3572_v21 = vadd.f32 %v1389_v60, %v1299_v57  ;;  %v3576_v62 = vadd.f32 %v1635_v44, %v1521_v47 }
 0x285   : > { %4006 = vst [vmem:[#allocation59_spill] sm:$0xff] %v3562_v11  ;;  %v1569_v51 = vadd.f32 %v4007_v2, %v1393_v17  ;;  %v3579_v17 = vmul.f32 %v3551_v26, %v1671_v46  ;;  %v3582_v10 = vmul.f32 %v3555_v48, %v1717_v35  ;;  %v667_v54 = vadd.f32 %v666_v40, %v3143_v12  ;;  %v4048_v11 = vld [vmem:[#allocation28_spill] sm:$0xff] }
 0x286   : > { %v2579_v39 = vpop.eup %2578  ;;  %4008 = vst [vmem:[#allocation60_spill] sm:$0xff] %v3570_v14  ;;  %4009 = vst [vmem:[#allocation61_spill] sm:$0xff] %v3572_v21  ;;  %v3594_v57 = vadd.f32 %v1611_v5, %v1485_v32  ;;  %v4021_v5 = vld [vmem:[#allocation41_spill] sm:$0xff] }
 0x287   : > { %v736_v3 = vmul.f32 %v2579_v39, %v661_v30  ;;  %v1659_v30 = vmul.f32 %v3547_v41, %v1647_v23  ;;  %v3574_v39 = vadd.f32 %v1587_v31, %v1439_v56  ;;  %4011 = vst [vmem:[#allocation63_spill] sm:$0xff] %v3576_v62  ;;  %4012 = vst [vmem:[#allocation64_spill] sm:$0xff] %v3579_v17  ;;  %v4033_v17 = vld [vmem:[#allocation20_spill] sm:$0xff] }
 0x288   : > { %v2581_v16 = vpop.eup %2580  ;;  %4013 = vst [vmem:[#allocation65_spill] sm:$0xff] %v3582_v10  ;;  %4014 = vst [vmem:[#allocation66_spill] sm:$0xff] %v3594_v57  ;;  %v3600_v31 = vrot.slane %v3495_v38, %v3066_v8  ;;  %v4017_v8 = vld [vmem:[#allocation31_spill] sm:$0xff]  ;;  %v4034_v57 = vld [vmem:[#allocation22_spill] sm:$0xff] }
 0x289   : > { %756 = vst [vmem:[#allocation2 + $0x28] sm:$0xff] %v736_v3  ;;  %v737_v0 = vmul.f32 %v2581_v16, %v663_v24  ;;  %4010 = vst [vmem:[#allocation62_spill] sm:$0xff] %v3574_v39  ;;  %v3596_v18 = vadd.f32 %v1659_v30, %v1569_v51  ;;  %v4018_v38 = vrot.slane %v4017_v8, 4  ;;  %v4019_v24 = vld [vmem:[#allocation32_spill] sm:$0xff]  ;;  %v4026_v51 = vld [vmem:[#allocation34_spill] sm:$0xff] }
 0x28a   : > { %v2583_v6 = vpop.eup %2582  ;;  %4016 = vst [vmem:[#allocation68_spill] sm:$0xff] %v3600_v31  ;;  %v4020_v46 = vrot.slane %v4019_v24, 4  ;;  %v4025_v24 = vld [vmem:[#allocation33_spill] sm:$0xff] }
 0x28b   : > { %757 = vst [vmem:[#allocation2 + $0x48] sm:$0xff] %v737_v0  ;;  %v738_v19 = vmul.f32 %v2583_v6, %v665_v7  ;;  %v3586_v27 = vmul.f32 %v3253_v43, %v737_v0  ;;  %v3589_v59 = vmul.f32 %v3256_v42, %v737_v0  ;;  %v3592_v60 = vmul.f32 %v3315_v33, %v737_v0  ;;  %v4022_v7 = vld [vmem:[#allocation42_spill] sm:$0xff] }
 0x28c   : > { %v2585_v56 = vpop.eup %2584  ;;  %4015 = vst [vmem:[#allocation67_spill] sm:$0xff] %v3596_v18  ;;  %v3605_v44 = vmul.f32 %v3323_v34, %v737_v0  ;;  %v1774_v32 = vmul.f32 %v3352_v28, %v737_v0  ;;  %v3637_v47 = vmul.f32 %v4026_v51, %v737_v0  ;;  %v4032_v18 = vld [vmem:[#allocation19_spill] sm:$0xff] }
 0x28d   : > { %758 = vst [vmem:[#allocation2 + $0x10] sm:$0xff] %v738_v19  ;;  %v739_v12 = vmul.f32 %v2585_v56, %v667_v54  ;;  %v3927_v43 = vrot.slane %v3586_v27, 4  ;;  %v3926_v40 = vrot.slane %v3589_v59, 4  ;;  %v3928_v23 = vrot.slane %v3592_v60, 4  ;;  %v4023_v19 = vld [vmem:[#allocation45_spill] sm:$0xff] }
 0x28e   : > { %v3941_v16 = vrot.slane %v3605_v44, 4  ;;  %v4024_v54 = vrot.slane %v4023_v19, 4  ;;  %v4028_v19 = vld [vmem:[#allocation36_spill] sm:$0xff] }
 0x28f   : > { %759 = vst [vmem:[#allocation2 + $0x40] sm:$0xff] %v739_v12  ;;  %v1514_v3 = vsel %vm882_vm0, %v4018_v38, %v3927_v43  ;;  %v1558_v35 = vsel %vm882_vm0, %v4020_v46, %v3926_v40  ;;  %v3623_v2 = vmul.f32 %v3352_v28, %v739_v12  ;;  %v3634_v46 = vmul.f32 %v4025_v24, %v737_v0  ;;  %v4030_v38 = vld [vmem:[#allocation48_spill] sm:$0xff] }
 0x290   : > { %v1524_v30 = vadd.f32 %v1514_v3, %v4021_v5  ;;  %v1572_v6 = vadd.f32 %v1558_v35, %v4022_v7  ;;  %v1700_v56 = vsel %vm882_vm0, %v4024_v54, %v3928_v23  ;;  %v1259_v8 = vld [vmem:[#allocation2 + $0x28] sm:$0x1]  ;;  %v1782_v28 = vrot.slane %v1774_v32, 4  ;;  %v4027_v7 = vld [vmem:[#allocation35_spill] sm:$0xff] }
 0x291   : > { %v1638_v40 = vmul.f32 %v4027_v7, %v737_v0  ;;  %v1662_v43 = vmul.f32 %v4028_v19, %v737_v0  ;;  %v4029_v54 = vld [vmem:[#allocation43_spill] sm:$0xff]  ;;  %v4031_v39 = vrot.slane %v4030_v38, 4  ;;  %v3654_v26 = vmul.f32 %v3437_v4, %v1259_v8  ;;  %v4035_v0 = vld [vmem:[#allocation26_spill] sm:$0xff] }
 0x292   : > { %v1260_v3 = vld [vmem:[#allocation2 + $0x48] sm:$0x1]  ;;  %v3643_v23 = vadd.f32 %v1700_v56, %v4029_v54  ;;  %v4036_v54 = vld [vmem:[#allocation21_spill] sm:$0xff] }
 0x293   : > { %v1306_v35 = vld [vmem:[#allocation2 + $0x48] sm:$0x3]  ;;  %v1746_v62 = vsel %vm882_vm0, %v4031_v39, %v3941_v16  ;;  %v1274_v32 = vmul.f32 %v4032_v18, %v1260_v3  ;;  %v1644_v14 = vadd.f32 %v1638_v40, %v1524_v30  ;;  %v3658_v38 = vadd.f32 %v1662_v43, %v1572_v6  ;;  %v4037_v18 = vld [vmem:[#allocation37_spill] sm:$0xff] }
 0x294   : > { %v1330_v5 = vld [vmem:[#allocation2 + $0x48] sm:$0x7]  ;;  %v1320_v12 = vmul.f32 %v4033_v17, %v1306_v35  ;;  %v4038_v35 = vld [vmem:[#allocation23_spill] sm:$0xff]  ;;  %v4043_v30 = vld [vmem:[#allocation25_spill] sm:$0xff] }
 0x295   : > { %v1344_v10 = vmul.f32 %v4034_v57, %v1330_v5  ;;  %v1354_v31 = vld [vmem:[#allocation2 + $0x48] sm:$0xf]  ;;  %v1289_v39 = vrot.slane %v1274_v32, 4  ;;  %v4039_v5 = vrot.slane %v3623_v2, 4  ;;  %v4044_v6 = vrot.slane %v4043_v30, 4  ;;  %v4050_v30 = vld [vmem:[#allocation29_spill] sm:$0xff] }
 0x296   : > { %v1402_v48 = vld [vmem:[#allocation2 + $0x48] sm:$0x3f]  ;;  %v1368_v56 = vmul.f32 %v4035_v0, %v1354_v31  ;;  %v1532_v0 = vld [vmem:[#allocation2 + $0x40] sm:$0x1]  ;;  %v4051_v45 = vrot.slane %v4050_v30, 4 }
 0x297   : > { %v1416_v41 = vmul.f32 %v4036_v54, %v1402_v48  ;;  %v1448_v29 = vld [vmem:[#allocation2 + $0x48] sm:$0x7f]  ;;  %v1350_v3 = vadd.f32 %v1344_v10, %v4037_v18  ;;  %v1786_v4 = vsel %vm882_vm0, %v1782_v28, %v4039_v5  ;;  %v4041_v48 = vld [vmem:[#allocation44_spill] sm:$0xff]  ;;  %v1290_v10 = vsel %vm882_vm0, %v4044_v6, %v1289_v39  ;;  %v1578_v21 = vld [vmem:[#allocation2 + $0x40] sm:$0x3] }
 0x298   : > { %v1378_v17 = vld [vmem:[#allocation2 + $0x48] sm:$0x1f]  ;;  %v1462_v57 = vmul.f32 %v4038_v35, %v1448_v29  ;;  %v3667_v54 = vadd.f32 %v1746_v62, %v4041_v48  ;;  %v1546_v35 = vmul.f32 %v3256_v42, %v1532_v0  ;;  %v1602_v5 = vld [vmem:[#allocation2 + $0x40] sm:$0x7]  ;;  %v4049_v62 = vrot.slane %v4048_v11, 4 }
 0x299   : > { %v4040_v8 = vld [vmem:[#allocation38_spill] sm:$0xff]  ;;  %v1431_v31 = vrot.slane %v1416_v41, 4  ;;  %v4047_v41 = vld [vmem:[#allocation27_spill] sm:$0xff]  ;;  %v1592_v11 = vmul.f32 %v4025_v24, %v1578_v21  ;;  %v1287_v24 = vrot.slane %v3654_v26, 4 }
 0x29a   : > { %v1374_v16 = vadd.f32 %v1368_v56, %v4040_v8  ;;  %v4042_v43 = vld [vmem:[#allocation46_spill] sm:$0xff]  ;;  %v1477_v29 = vrot.slane %v1462_v57, 4  ;;  %v1302_v56 = vadd.f32 %v1290_v10, %v4046_v13  ;;  %v1392_v8 = vmul.f32 %v4047_v41, %v1378_v17  ;;  %v4053_v10 = vld [vmem:[#allocation40_spill] sm:$0xff] }
 0x29b   : > { %v1794_v40 = vadd.f32 %v1782_v28, %v4042_v43  ;;  %v4045_v32 = vld [vmem:[#allocation30_spill] sm:$0xff]  ;;  %v1432_v48 = vsel %vm882_vm0, %v4049_v62, %v1431_v31  ;;  %v1626_v28 = vld [vmem:[#allocation2 + $0x40] sm:$0xf]  ;;  %v1796_v43 = vadd.f32 %v1786_v4, %v1644_v14  ;;  %v4052_v57 = vrot.slane %v3586_v27, 4  ;;  %v4054_v14 = vld [vmem:[#allocation39_spill] sm:$0xff] }
 0x29c   : > { %v1326_v18 = vadd.f32 %v1320_v12, %v4045_v32  ;;  %v1478_v39 = vsel %vm882_vm0, %v4051_v45, %v1477_v29  ;;  %v1490_v12 = vadd.f32 %v1477_v29, %v1350_v3  ;;  %v1561_v0 = vrot.slane %v1546_v35, 4  ;;  %v1650_v6 = vld [vmem:[#allocation2 + $0x40] sm:$0x1f] }
 0x29d   : > { %v1526_v42 = vadd.f32 %v4052_v57, %v1374_v16  ;;  %v1674_v32 = vld [vmem:[#allocation2 + $0x40] sm:$0x3f]  ;;  %v1398_v13 = vadd.f32 %v1392_v8, %v1302_v56  ;;  %v1488_v17 = vadd.f32 %v1478_v39, %v4053_v10  ;;  %v1616_v41 = vmul.f32 %v4026_v51, %v1602_v5 }
 0x29e   : > { %v1720_v62 = vld [vmem:[#allocation2 + $0x40] sm:$0x7f]  ;;  %v1442_v4 = vadd.f32 %v1432_v48, %v4054_v14  ;;  %v1444_v30 = vadd.f32 %v1431_v31, %v1326_v18  ;;  %v4055_v45 = vrot.slane %v3589_v59, 4  ;;  %v1640_v27 = vmul.f32 %v4027_v7, %v1626_v28  ;;  %v1305_v31 = vld [vmem:[#allocation2 + $0x28] sm:$0x3] }
 0x29f   : > { %v1622_v29 = vadd.f32 %v1616_v41, %v1490_v12  ;;  %v1664_v35 = vmul.f32 %v4028_v19, %v1650_v6  ;;  %v1688_v56 = vmul.f32 %v3315_v33, %v1674_v32  ;;  %v1734_v21 = vmul.f32 %v3323_v34, %v1720_v62  ;;  %v4056_v33 = vld [vmem:[#allocation47_spill] sm:$0xff]  ;;  %v1329_v12 = vld [vmem:[#allocation2 + $0x28] sm:$0x7] }
 0x2a0   : > { %v1562_v3 = vsel %vm882_vm0, %v4055_v45, %v1561_v0  ;;  %v1646_v8 = vadd.f32 %v1640_v27, %v1526_v42  ;;  %v1838_v51 = vrot.slane %v3658_v38, 1  ;;  %v1620_v59 = vadd.f32 %v3637_v47, %v1488_v17  ;;  %v1401_v17 = vld [vmem:[#allocation2 + $0x28] sm:$0x3f] }
 0x2a1   : > { %v1574_v16 = vadd.f32 %v1562_v3, %v1398_v13  ;;  %v1703_v5 = vrot.slane %v1688_v56, 4  ;;  %v1809_v7 = vrot.slane %v3667_v54, 1  ;;  %v1596_v48 = vadd.f32 %v3634_v46, %v1442_v4  ;;  %v1353_v62 = vld [vmem:[#allocation2 + $0x28] sm:$0xf] }
 0x2a2   : > { %v1598_v19 = vadd.f32 %v1592_v11, %v1444_v30  ;;  %v1749_v28 = vrot.slane %v1734_v21, 4  ;;  %v4057_v39 = vrot.slane %v4056_v33, 1  ;;  %v4058_v38 = vrot.slane %v3592_v60, 4  ;;  %v1447_v14 = vld [vmem:[#allocation2 + $0x28] sm:$0x7f] }
 0x2a3   : > { %v1670_v18 = vadd.f32 %v1664_v35, %v1574_v16  ;;  %v4059_v47 = vrot.slane %v3623_v2, 4  ;;  %v1319_v54 = vmul.f32 %v3448_v61, %v1305_v31  ;;  %v4060_v0 = vrot.slane %v3605_v44, 4  ;;  %v1377_v21 = vld [vmem:[#allocation2 + $0x28] sm:$0x1f] }
 0x2a4   : > { %v1839_v34 = vsel %vm1805_vm1, %v4057_v39, %v1838_v51  ;;  %v1704_v26 = vsel %vm882_vm0, %v4058_v38, %v1703_v5  ;;  %v1762_v6 = vadd.f32 %v1749_v28, %v1622_v29  ;;  %v4061_v13 = vrot.slane %v3463_v55, 4 }
 0x2a5   : > { %v1798_v57 = vadd.f32 %v4059_v47, %v1646_v8  ;;  %v1842_v42 = vrot.slane %v1670_v18, 1  ;;  %v1750_v46 = vsel %vm882_vm0, %v4060_v0, %v1749_v28  ;;  %v1851_v32 = vadd.f32 %v1839_v34, %v1794_v40  ;;  %v1531_v28 = vld [vmem:[#allocation2 + $0x10] sm:$0x1] }
 0x2a6   : > { %v1288_v10 = vsel %vm882_vm0, %v4061_v13, %v1287_v24  ;;  %v1760_v60 = vadd.f32 %v1750_v46, %v1620_v59  ;;  %v1343_v2 = vmul.f32 %v3470_v63, %v1329_v12  ;;  %v1714_v61 = vadd.f32 %v1704_v26, %v1596_v48 }
 0x2a7   : > { %v1843_v11 = vsel %vm1805_vm1, %v1838_v51, %v1842_v42  ;;  %v1855_v41 = vadd.f32 %v1842_v42, %v1798_v57  ;;  %v1716_v4 = vadd.f32 %v1703_v5, %v1598_v19  ;;  %v1814_v44 = vrot.slane %v1762_v6, 1 }
 0x2a8   : > { %v1853_v30 = vadd.f32 %v1843_v11, %v1796_v43  ;;  %v1810_v45 = vrot.slane %v1760_v60, 1  ;;  %v1301_v40 = vadd.f32 %v1288_v10, %v3443_v58  ;;  %v1415_v55 = vmul.f32 %v3457_v15, %v1401_v17  ;;  %v3724_v43 = vld [vmem:[#allocation2 + $0x28] sm:$0xff]  ;;  %v4067_v10 = vld [vmem:[#allocation52_spill] sm:$0xff]  ;;  %v1601_v11 = vld [vmem:[#allocation2 + $0x10] sm:$0x7] }
 0x2a9   : > { %v1871_v3 = vrot.slane %v1855_v41, 2  ;;  %v1866_v27 = vrot.slane %v1851_v32, 2  ;;  %v1367_v29 = vmul.f32 %v3476_v53, %v1353_v62  ;;  %v1461_v35 = vmul.f32 %v3473_v49, %v1447_v14  ;;  %v4069_v41 = vld [vmem:[#allocation59_spill] sm:$0xff] }
 0x2aa   : > { %v1867_v16 = vrot.slane %v1853_v30, 2  ;;  %v1811_v63 = vsel %vm1805_vm1, %v1809_v7, %v1810_v45  ;;  %v1815_v56 = vsel %vm1805_vm1, %v1810_v45, %v1814_v44  ;;  %v1827_v8 = vadd.f32 %v1814_v44, %v1716_v4  ;;  %v1577_v14 = vld [vmem:[#allocation2 + $0x10] sm:$0x3]  ;;  %v4071_v30 = vld [vmem:[#allocation61_spill] sm:$0xff] }
 0x2ab   : > { %v1429_v51 = vrot.slane %v1415_v55, 4  ;;  %v1823_v24 = vadd.f32 %v1811_v63, %v3643_v23  ;;  %v1825_v58 = vadd.f32 %v1815_v56, %v1714_v61  ;;  %v1325_v53 = vadd.f32 %v1319_v54, %v3454_v22  ;;  %v4062_v23 = vld [vmem:[#allocation50_spill] sm:$0xff]  ;;  %v4070_v61 = vld [vmem:[#allocation53_spill] sm:$0xff]  ;;  %v1649_v4 = vld [vmem:[#allocation2 + $0x10] sm:$0x1f] }
 0x2ac   : > { %v1868_v15 = vsel %vm1862_vm2, %v1866_v27, %v1867_v16  ;;  %v1872_v31 = vsel %vm1862_vm2, %v1867_v16, %v1871_v3  ;;  %v1884_v59 = vadd.f32 %v1871_v3, %v1827_v8  ;;  %v1349_v49 = vadd.f32 %v1343_v2, %v3459_v37  ;;  %v4064_v37 = vld [vmem:[#allocation51_spill] sm:$0xff]  ;;  %v4072_v55 = vld [vmem:[#allocation60_spill] sm:$0xff] }
 0x2ad   : > { %v1475_v18 = vrot.slane %v1461_v35, 4  ;;  %v1880_v5 = vadd.f32 %v1868_v15, %v1823_v24  ;;  %v1882_v7 = vadd.f32 %v1872_v31, %v1825_v58  ;;  %v1391_v48 = vmul.f32 %v3490_v1, %v1377_v21  ;;  %v1625_v3 = vld [vmem:[#allocation2 + $0x10] sm:$0xf]  ;;  %v4074_v21 = vld [vmem:[#allocation54_spill] sm:$0xff]  ;;  %v4075_v24 = vld [vmem:[#allocation56_spill] sm:$0xff] }
 0x2ae   : > { %v1503_v19 = vmul.f32 %v3483_v25, %v3724_v43  ;;  %v3735_v33 = vadd.f32 %v4062_v23, %v1884_v59  ;;  %v1373_v39 = vadd.f32 %v1367_v29, %v3486_v52  ;;  %v4063_v34 = vrot.slane %v3480_v9, 4  ;;  %v4073_v29 = vld [vmem:[#allocation55_spill] sm:$0xff] }
 0x2af   : > { %v1543_v12 = vmul.f32 %v4064_v37, %v3724_v43  ;;  %v3744_v38 = vadd.f32 %v4062_v23, %v1880_v5  ;;  %v3747_v1 = vadd.f32 %v4062_v23, %v1882_v7  ;;  %v1397_v25 = vadd.f32 %v1391_v48, %v1301_v40  ;;  %v1673_v40 = vld [vmem:[#allocation2 + $0x10] sm:$0x3f] }
 0x2b0   : > { %v1430_v22 = vsel %vm882_vm0, %v4063_v34, %v1429_v51  ;;  %v1511_v26 = vrot.slane %v1503_v19, 4  ;;  %v2342_v47 = vmul.f32 -1.442695, %v3735_v33  ;;  %v4065_v57 = vrot.slane %v3499_v36, 4  ;;  %v1719_v56 = vld [vmem:[#allocation2 + $0x10] sm:$0x7f] }
 0x2b1   : > { %v1545_v9 = vmul.f32 %v4064_v37, %v1531_v28  ;;  %v1555_v42 = vrot.slane %v1543_v12, 4  ;;  %v2338_v54 = vmul.f32 -1.442695, %v3744_v38  ;;  %v2340_v0 = vmul.f32 -1.442695, %v3747_v1  ;;  %v1763_v31 = vld [vmem:[#allocation2 + $0x10] sm:$0xff] }
 0x2b2   : > { %v1476_v52 = vsel %vm882_vm0, %v4065_v57, %v1475_v18  ;;  %v1441_v46 = vadd.f32 %v1430_v22, %v3559_v20  ;;  %v1443_v6 = vadd.f32 %v1429_v51, %v1325_v53  ;;  %2586 = vpow2.f32 %v2342_v47  ;;  %v4077_v19 = vld [vmem:[#allocation58_spill] sm:$0xff]  ;;  %v4078_v22 = vld [vmem:[#allocation68_spill] sm:$0xff] }
 0x2b3   : > { %v4066_v32 = vrot.slane %v3504_v50, 4  ;;  %v4068_v17 = vrot.slane %v4067_v10, 4  ;;  %v1559_v60 = vrot.slane %v1545_v9, 4  ;;  %2588 = vpow2.f32 %v2338_v54  ;;  %v4079_v54 = vld [vmem:[#allocation18_spill] sm:$0xff]  ;;  %v4081_v10 = vld [vmem:[#allocation65_spill] sm:$0xff] }
 0x2b4   : > { %v1487_v2 = vadd.f32 %v1476_v52, %v4069_v41  ;;  %v1489_v62 = vadd.f32 %v1475_v18, %v1349_v49  ;;  %v1589_v20 = vmul.f32 %v4070_v61, %v3724_v43  ;;  %2590 = vpow2.f32 %v2340_v0  ;;  %v4076_v49 = vld [vmem:[#allocation57_spill] sm:$0xff] }
 0x2b5   : > { %v1512_v13 = vsel %vm882_vm0, %v4066_v32, %v1511_v26  ;;  %v1556_v36 = vsel %vm882_vm0, %v4068_v17, %v1555_v42  ;;  %v1525_v44 = vadd.f32 %v1511_v26, %v1373_v39  ;;  %v1560_v50 = vsel %vm882_vm0, %v1555_v42, %v1559_v60  ;;  %v4080_v0 = vld [vmem:[#allocation49_spill] sm:$0xff] }
 0x2b6   : > { %v1571_v45 = vadd.f32 %v1556_v36, %v4071_v30  ;;  %v1523_v27 = vadd.f32 %v1512_v13, %v4072_v55  ;;  %v1573_v16 = vadd.f32 %v1560_v50, %v1397_v25  ;;  %v1613_v35 = vmul.f32 %v4073_v29, %v3724_v43  ;;  %v4086_v50 = vld [vmem:[#allocation67_spill] sm:$0xff] }
 0x2b7   : > { %v1615_v63 = vmul.f32 %v4073_v29, %v1601_v11  ;;  %v1591_v8 = vmul.f32 %v4070_v61, %v1577_v14  ;;  %v1637_v51 = vmul.f32 %v4074_v21, %v3724_v43  ;;  %v1661_v58 = vmul.f32 %v4075_v24, %v3724_v43  ;;  %v4083_v11 = vld [vmem:[#allocation66_spill] sm:$0xff]  ;;  %v4088_v55 = vld [vmem:[#allocation63_spill] sm:$0xff] }
 0x2b8   : > { %v1663_v15 = vmul.f32 %v4075_v24, %v1649_v4  ;;  %v1619_v59 = vadd.f32 %v1613_v35, %v1487_v2  ;;  %v1639_v53 = vmul.f32 %v4074_v21, %v1625_v3  ;;  %v1685_v18 = vmul.f32 %v4076_v49, %v3724_v43 }
 0x2b9   : > { %v1687_v5 = vmul.f32 %v4076_v49, %v1673_v40  ;;  %v1667_v7 = vadd.f32 %v1661_v58, %v1571_v45  ;;  %v1731_v28 = vmul.f32 %v4077_v19, %v3724_v43  ;;  %v1733_v23 = vmul.f32 %v4077_v19, %v1719_v56 }
 0x2ba   : > { %v1669_v48 = vadd.f32 %v1663_v15, %v1573_v16  ;;  %v1621_v39 = vadd.f32 %v1615_v63, %v1489_v62  ;;  %v1696_v34 = vrot.slane %v1685_v18, 4  ;;  %v1773_v37 = vmul.f32 %v4078_v22, %v3724_v43 }
 0x2bb   : > { %v1775_v12 = vmul.f32 %v4078_v22, %v1763_v31  ;;  %v1701_v25 = vrot.slane %v1687_v5, 4  ;;  %v1742_v26 = vrot.slane %v1731_v28, 4  ;;  %v1747_v47 = vrot.slane %v1733_v23, 4 }
 0x2bc   : > { %v1835_v57 = vrot.slane %v1667_v7, 1  ;;  %v1595_v52 = vadd.f32 %v1589_v20, %v1441_v46  ;;  %v1645_v9 = vadd.f32 %v1639_v53, %v1525_v44  ;;  %v1781_v42 = vrot.slane %v1773_v37, 4  ;;  %v4084_v46 = vld [vmem:[#allocation64_spill] sm:$0xff] }
 0x2bd   : > { %v1890_v32 = vrot.slane %v4080_v0, %v4079_v54  ;;  %v1643_v13 = vadd.f32 %v1637_v51, %v1523_v27  ;;  %v4082_v17 = vrot.slane %v4081_v10, 4  ;;  %v1748_v60 = vsel %vm882_vm0, %v1742_v26, %v1747_v47 }
 0x2be   : > { %v1840_v43 = vrot.slane %v1669_v48, 1  ;;  %v1759_v2 = vadd.f32 %v1748_v60, %v1619_v59  ;;  %v1761_v62 = vadd.f32 %v1747_v47, %v1621_v39  ;;  %v1783_v14 = vrot.slane %v1775_v12, 4  ;;  %v4089_v59 = vld [vmem:[#allocation62_spill] sm:$0xff] }
 0x2bf   : > { %v1743_v36 = vsel %vm882_vm0, %v4082_v17, %v1742_v26  ;;  %v1597_v61 = vadd.f32 %v1591_v8, %v1443_v6  ;;  %v4085_v20 = vrot.slane %v4084_v46, 4  ;;  %v1702_v44 = vsel %vm882_vm0, %v1696_v34, %v1701_v25  ;;  %v2587_v3 = vpop.eup %2586 }
 0x2c0   : > { %v1757_v41 = vadd.f32 %v1743_v36, %v4083_v11  ;;  %v4087_v30 = vrot.slane %v4086_v50, 1  ;;  %v1784_v40 = vsel %vm882_vm0, %v1781_v42, %v1783_v14  ;;  %v1793_v27 = vadd.f32 %v1781_v42, %v4088_v55  ;;  %v2589_v35 = vpop.eup %2588 }
 0x2c1   : > { %v1697_v4 = vsel %vm882_vm0, %v4085_v20, %v1696_v34  ;;  %v1797_v16 = vadd.f32 %v1783_v14, %v1645_v9  ;;  %v1807_v29 = vrot.slane %v1759_v2, 1  ;;  %v1926_v63 = vadd.f32 1.0, %v2587_v3  ;;  %v2591_v21 = vpop.eup %2590 }
 0x2c2   : > { %v1836_v45 = vsel %vm1805_vm1, %v4087_v30, %v1835_v57  ;;  %v1806_v6 = vrot.slane %v1757_v41, 1  ;;  %v1812_v56 = vrot.slane %v1761_v62, 1  ;;  %v1841_v8 = vsel %vm1805_vm1, %v1835_v57, %v1840_v43 }
 0x2c3   : > { %v1922_v51 = vadd.f32 1.0, %v2589_v35  ;;  %v1795_v24 = vadd.f32 %v1784_v40, %v1643_v13  ;;  %v1850_v58 = vadd.f32 %v1836_v45, %v1793_v27  ;;  %v1854_v15 = vadd.f32 %v1840_v43, %v1797_v16  ;;  %v2343_v35 = vld [vmem:[%s3882_s6] ss:$0 sm:$0xff] }
 0x2c4   : > { %v1924_v31 = vadd.f32 1.0, %v2591_v21  ;;  %2592 = vrcp.f32 %v1926_v63  ;;  %v1711_v53 = vadd.f32 %v1697_v4, %v4089_v59  ;;  %v1715_v49 = vadd.f32 %v1701_v25, %v1597_v61 }
 0x2c5   : > { %2594 = vrcp.f32 %v1922_v51  ;;  %v1808_v18 = vsel %vm1805_vm1, %v1806_v6, %v1807_v29  ;;  %v1813_v5 = vsel %vm1805_vm1, %v1807_v29, %v1812_v56  ;;  %v1852_v7 = vadd.f32 %v1841_v8, %v1795_v24  ;;  %v2611_v51 = vld [vmem:[%s3035_s17] sm:$0xff] }
 0x2c6   : > { %2596 = vrcp.f32 %v1924_v31  ;;  %v1713_v48 = vadd.f32 %v1702_v44, %v1595_v52  ;;  %v1826_v19 = vadd.f32 %v1812_v56, %v1715_v49  ;;  %v1869_v28 = vrot.slane %v1854_v15, 2  ;;  %v2612_v31 = vld [vmem:[%s3035_s17 + $0x8] sm:$0xff] }
 0x2c7   : > { %v1863_v23 = vrot.slane %v1850_v58, 2  ;;  %v1864_v39 = vrot.slane %v1852_v7, 2  ;;  %v1822_v34 = vadd.f32 %v1808_v18, %v1711_v53 }
 0x2c8   : > { %v1824_v22 = vadd.f32 %v1813_v5, %v1713_v48  ;;  %v1883_v37 = vadd.f32 %v1869_v28, %v1826_v19 }
 0x2c9   : > { %v1865_v12 = vsel %vm1862_vm2, %v1863_v23, %v1864_v39  ;;  %v1870_v26 = vsel %vm1862_vm2, %v1864_v39, %v1869_v28 }
 0x2ca   : > { %v1879_v25 = vadd.f32 %v1865_v12, %v1822_v34  ;;  %v1881_v47 = vadd.f32 %v1870_v26, %v1824_v22  ;;  %v1901_v57 = vadd.f32 %v1890_v32, %v1883_v37 }
 0x2cc   : > { %v1897_v9 = vadd.f32 %v1890_v32, %v1879_v25  ;;  %v1899_v42 = vadd.f32 %v1890_v32, %v1881_v47  ;;  %v2341_v54 = vmul.f32 -1.442695, %v1901_v57 }
 0x2ce   : > { %v2337_v0 = vmul.f32 -1.442695, %v1897_v9  ;;  %v2339_v13 = vmul.f32 -1.442695, %v1899_v42  ;;  %2598 = vpow2.f32 %v2341_v54 }
 0x2d0   : > { %2600 = vpow2.f32 %v2337_v0 }
 0x2d1   : > { %v2593_v52 = vpop.eup %2592  ;;  %2602 = vpow2.f32 %v2339_v13 }
 0x2d2   : > { %v2595_v10 = vpop.eup %2594  ;;  %v1944_v17 = vmul.f32 %v2593_v52, %v3735_v33 }
 0x2d3   : > { %v2597_v36 = vpop.eup %2596  ;;  %v1940_v60 = vmul.f32 %v2595_v10, %v3744_v38 }
 0x2d4   : > { %v1942_v43 = vmul.f32 %v2597_v36, %v3747_v1  ;;  %v1948_v11 = vpack.c.bf16 %v1944_v17, %v1944_v17 }
 0x2d6   : > { %v1946_v41 = vpack.c.bf16 %v1942_v43, %v1940_v60  ;;  %v1997_v62 = vrot.slane %v1948_v11, 1 }
 0x2d8   : > { %v1996_v2 = vrot.slane %v1946_v41, 1 }
 0x2da   : > { %v1998_v32 = vsel %vm1805_vm1, %v1996_v2, %v1997_v62 }
 0x2db   : > { %v2599_v14 = vpop.eup %2598  ;;  %2129 = vmatprep.mubr.bf16.mxu0 %v1998_v32 }
 0x2dc   : > { %v1925_v61 = vadd.f32 1.0, %v2599_v14 }
 0x2dd   : > { %v2601_v46 = vpop.eup %2600 }
 0x2de   : > { %v2603_v20 = vpop.eup %2602  ;;  %v1921_v4 = vadd.f32 1.0, %v2601_v46  ;;  %2604 = vrcp.f32 %v1925_v61 }
 0x2df   : > { %v1923_v44 = vadd.f32 1.0, %v2603_v20 }
 0x2e0   : > { %2606 = vrcp.f32 %v1921_v4 }
 0x2e1   : > { %2608 = vrcp.f32 %v1923_v44 }
 0x2eb   : > { %v2605_v33 = vpop.eup %2604 }
 0x2ec   : > { %v1943_v38 = vmul.f32 %v2605_v33, %v1901_v57 }
 0x2ed   : > { %v2607_v50 = vpop.eup %2606 }
 0x2ee   : > { %v2609_v1 = vpop.eup %2608  ;;  %v1939_v30 = vmul.f32 %v2607_v50, %v1897_v9  ;;  %v1947_v3 = vpack.c.bf16 %v1943_v38, %v1943_v38 }
 0x2ef   : > { %v1941_v45 = vmul.f32 %v2609_v1, %v1899_v42 }
 0x2f0   : > { %v1994_v27 = vrot.slane %v1947_v3, 1 }
 0x2f1   : > { %v1945_v40 = vpack.c.bf16 %v1941_v45, %v1939_v30 }
 0x2f3   : > { %v1993_v55 = vrot.slane %v1945_v40, 1 }
 0x2f5   : > { %v1995_v16 = vsel %vm1805_vm1, %v1993_v55, %v1994_v27 }
 0x2f6   : > { %2130 = vmatmul.mubr.bf16.vlgmr.msra.gmra.mxu0 %v1995_v16 }
 0x3b6   : > { %v2383_v29 = vpop.f32.mrf.mxu0 }
 0x3b8   : > { %v2384_v63 = vpop.f32.mrf.mxu0 }
 0x3b9   : > { %v2385_v6 = vadd.f32 %v2384_v63, %v2383_v29 }
 0x3ba   : > { %v2386_v56 = vpop.f32.mrf.mxu0 }
 0x3bb   : > { %v2132_v8 = vadd.f32 %v2385_v6, %v2343_v35 }
 0x3bc   : > { %v2387_v21 = vpop.f32.mrf.mxu0 }
 0x3bd   : > { %v2138_v24 = vadd.f32 %v2611_v51, %v2132_v8  ;;  %v2388_v58 = vadd.f32 %v2387_v21, %v2386_v56 }
 0x3bf   : > { %2140 = vst [vmem:[%s370_s13] sm:$0xff] %v2138_v24  ;;  %v2135_v15 = vadd.f32 %v2388_v58, %v2343_v35 }
 0x3c1   : > { %v2139_v59 = vadd.f32 %v2612_v31, %v2135_v15 }
 0x3c3   : > { %2141 = vst [vmem:[%s370_s13 + $0x8] sm:$0xff] %v2139_v59 }
 0x3c4   : > { %2758 = shalt.err (!%p2755_p8)
}
 0x3c5   : > { %s2759_s17 = scalar_lea.hbm %s3827_s22, 256  ;;  %s2763_s9 = scalar_lea.hbm %s3883_s7, 512 }
 0x3c6   : > { %p2760_p7 = scmp.ne.s32.totalorder %s3827_s22, %s2759_s17  ;;  %p2764_p9 = scmp.lt.s32.totalorder %s3827_s22, %s3883_s7 }
 0x3c7   : > { %p2765_p13 = scmp.lt.s32.totalorder %s2763_s9, %s2759_s17 }
 0x3c8   : > { %p2761_p12 = pnand %p2760_p7, %p3002_p4 }
 0x3c9   : > { %p2766_p1 = por %p2765_p13, %p2764_p9 }
 0x3ca   : > { %p2762_p6 = pneg %p2761_p12 }
 0x3cc   : > { %p2767_p0 = pnand %p2766_p1, %p2762_p6 }
 0x3ce   : > { %2770 = shalt.err (!%p2767_p0)
}
 0x3cf   : > { %s2849_s10 = smov 128   ;;  %s2850_s16 = smov 8  }
 0x3d0   : > { %2407 = dma.vmem_to_hbm [thread:$0]  (%p3002_p4), %s3822_s14, 256, %s3827_s22, %s2143_s18, %s2849_s10, %s2849_s10, %s2850_s16  }
 0x3d1 PF: > { %s2173_s15 = sand.u32 1, %s2813_s24   ;;  %p4090_p11 = scmp.ne.s32.totalorder %s3951_s12, 0 }
 0x3d2   : > { %p4091_p2 = scmp.ge.s32.totalorder %s2833_s29, 2  ;;  %s2174_s8 = scalar_lea.sflag [#allocation6], %s2173_s15 }
 0x3d4   : > { %p2427_p5 = pnand %p4091_p2, %p4090_p11 }
 0x3d6   : > { %p2428_p3 = pneg %p2427_p5 }
 0x3d8   : > { %2808 = dma.done.wait (%p2428_p3), %s2174_s8, 256  }
 0x3d9   : > { %2810 = vsyncadd (%p2428_p3), %s2174_s8, 4294967040  ;;  %s25_s29 = sadd.s32 1, %s2833_s29   ;;  %s4092_s24 = smov %s2817_s25 }
 0x3da   : > { %p22_p10 = scmp.ge.s32.totalorder %s25_s29, 4   ;;  %s4093_s25 = smov %s2821_s26 }
 0x3db   : > { %s4094_s26 = smov %s3011_s23  ;;  %s4095_s27 = smov %s2829_s28 }
 0x3dc   : > { %s4096_s28 = smov %s4098_s19  ;;  %24 = sbr.rel (!%p22_p10) target bundleno = 12 (0xc), region = 113 }
 0x3e1   :  { %2179 = vsyncpa [#allocation5], 1 }
 0x3e2   :  { %2181 = vsyncpa [#allocation5 + $0x1], 1 }
 0x3e3   :  { %2182 = vsyncpa [#allocation8], 1 }
 0x3e4   :  { %2183 = vsyncpa [#allocation11], 1 }
 0x3e5   :  { %2184 = vsyncpa [#allocation6], 1 }
 0x3e6   :  { %2186 = vsyncpa [#allocation6 + $0x1], 1 }

</bundles_post_ra>
